<compile_context>
chip_gen: v5e
topology: v5e:2x2
jax: 0.10.0
libtpu: 0.0.40
codegen_flags: <defaults>
</compile_context>

<pallas_src>
import math

import jax
import jax.numpy as jnp
from jax.experimental import pallas as pl
from jax.experimental.pallas import tpu as pltpu

PLANES = 64          # output channels per branch
KMAX = 7             # largest branch kernel (shared stencil)
REDUCTION = 16       # SELayer reduction
BN_EPS = 1e-5

# bf16 operands for the dominant matmul (f32 accumulation / epilogue).
MATMUL_DTYPE = jnp.bfloat16


def _round_up(v, m):
    return (v + m - 1) // m * m


# ----------------------------------------------------------------------------
# Parameter construction (deterministic, matches module shapes, BN pre-folded)
# ----------------------------------------------------------------------------

def _kaiming_conv(key, K, cin, cout):
    # kaiming_normal_ (fan_in, gain=sqrt(2)); weight stored HWIO: (K,K,Cin,Cout)
    fan_in = K * K * cin
    std = math.sqrt(2.0 / fan_in)
    return jax.random.normal(key, (K, K, cin, cout), jnp.float32) * std


def make_params(inplanes, key):
    planes = PLANES
    C = 5 * planes                      # 320
    Cr = C // REDUCTION                 # 20
    ks = jax.random.split(key, 8)

    # Folded eval-mode BatchNorm (mean=0, var=1, gamma=1, beta=0) -> pure scale.
    bn_s = 1.0 / math.sqrt(1.0 + BN_EPS)

    # Branch conv weights, embedded into a shared 7x7 stencil so all four
    # branches become ONE matmul with output channels [x1 | x2 | x3 | x4].
    branch_ks = (1, 3, 5, 7)
    ws = [_kaiming_conv(ks[i], k, inplanes, planes)
          for i, k in enumerate(branch_ks)]

    def embed(w, k):
        off = (KMAX - k) // 2
        return jnp.pad(w, ((off, off), (off, off), (0, 0), (0, 0)))

    w_main = jnp.concatenate([embed(w, k) for w, k in zip(ws, branch_ks)],
                             axis=-1)                               # (7,7,Cin,256)
    w_main = (w_main * bn_s).reshape(KMAX * KMAX * inplanes, 4 * planes)

    return {
        # BN scale folded into every conv weight (biases are zero in eval init).
        "w_main": w_main,                                                    # (49*Cin, 256)
        "w_gap": _kaiming_conv(ks[4], 1, inplanes, planes
                               ).reshape(inplanes, planes) * bn_s,           # (Cin, 64)
        "w_conv1": _kaiming_conv(ks[5], 1, C, planes
                                 ).reshape(C, planes) * bn_s,                # (320, 64)
        # SELayer linears (bias-free), deterministic init
        "se_fc1": jax.random.normal(ks[6], (C, Cr), jnp.float32) / math.sqrt(C),
        "se_fc2": jax.random.normal(ks[7], (Cr, C), jnp.float32) / math.sqrt(Cr),
    }


# ----------------------------------------------------------------------------
# Fused forward: one pallas_call, grid=(N,)
# ----------------------------------------------------------------------------

def inception_forward(x_nchw, kp):
    x = jnp.transpose(x_nchw, (0, 2, 3, 1)).astype(jnp.float32)     # NCHW -> NHWC
    N, H, W, Cin = x.shape
    HW = H * W
    K = KMAX
    pad = (K - 1) // 2
    C4 = 4 * PLANES                     # 256
    C5 = 5 * PLANES                     # 320
    Cr = C5 // REDUCTION                # 20

    # --- global-average-pool branch done on the wrapper side in f32 (tiny) ---
    pooled = jnp.mean(x, axis=(1, 2))                               # (N, Cin)
    gap = jnp.maximum(pooled @ kp["w_gap"], 0.0)                    # (N, 64); BN folded, ReLU
    gap = gap.reshape(N, 1, PLANES)

    # --- im2col prepared once (lane-dense deep contraction), single max-halo pad
    xp = jnp.pad(x, ((0, 0), (pad, pad), (pad, pad), (0, 0)))
    cols = [xp[:, kh:kh + H, kw:kw + W, :]
            for kh in range(K) for kw in range(K)]
    patches = jnp.concatenate(cols, axis=-1).reshape(N, HW, K * K * Cin)
    KKC = K * K * Cin
    KKCp = _round_up(KKC, 128)
    patches = jnp.pad(patches, ((0, 0), (0, 0), (0, KKCp - KKC)))
    patches = patches.astype(MATMUL_DTYPE)

    w_main = jnp.pad(kp["w_main"], ((0, KKCp - KKC), (0, 0))).astype(MATMUL_DTYPE)

    def kernel(p_ref, wmain_ref, gap_ref, fc1_ref, fc2_ref, wc1_ref, o_ref):
        # -- four conv branches (1/3/5/7) as one deep-contraction 256-wide matmul
        br = jnp.dot(p_ref[...], wmain_ref[...],
                     preferred_element_type=jnp.float32)            # (HW, 256)
        br = jnp.maximum(br, 0.0)                                   # BN folded, ReLU

        gap = gap_ref[...]                                          # (1, 64), precomputed

        # -- squeeze-excite over the (virtual) 320-channel concat
        mean_br = jnp.mean(br, axis=0, keepdims=True)               # (1, 256)
        h = (jnp.dot(mean_br, fc1_ref[:C4, :],
                     preferred_element_type=jnp.float32) +
             jnp.dot(gap, fc1_ref[C4:, :],
                     preferred_element_type=jnp.float32))           # (1, Cr)
        h = jnp.maximum(h, 0.0)
        se = jax.nn.sigmoid(
            jnp.dot(h, fc2_ref[...],
                    preferred_element_type=jnp.float32))            # (1, 320)

        # -- final 1x1 conv: fold the SE gate into the weight ROWS so the
        #    (HW, 256) activation is never rescaled and the (HW, 320) concat /
        #    (HW, 64) x5 broadcast are never materialized.
        wc1 = wc1_ref[...]                                          # (320, 64); bn1 folded
        w_br = wc1[:C4, :] * jnp.transpose(se[:, :C4])              # (256, 64)
        w_gp = wc1[C4:, :] * jnp.transpose(se[:, C4:])              # (64, 64)
        out = jnp.dot(br, w_br, preferred_element_type=jnp.float32)        # (HW, 64)
        out = out + jnp.dot(gap, w_gp, preferred_element_type=jnp.float32)  # bcast (1,64)
        o_ref[...] = jnp.maximum(out, 0.0)                          # bn1 folded, ReLU

    out = pl.pallas_call(
        kernel,
        out_shape=jax.ShapeDtypeStruct((N, HW, PLANES), jnp.float32),
        grid=(N,),
        in_specs=[
            pl.BlockSpec((None, HW, KKCp), lambda n: (n, 0, 0)),    # im2col patches (bf16)
            pl.BlockSpec((KKCp, C4), lambda n: (0, 0)),             # fused branch weight (bf16)
            pl.BlockSpec((None, 1, PLANES), lambda n: (n, 0, 0)),   # GAP branch (f32)
            pl.BlockSpec((C5, Cr), lambda n: (0, 0)),               # SE fc1
            pl.BlockSpec((Cr, C5), lambda n: (0, 0)),               # SE fc2
            pl.BlockSpec((C5, PLANES), lambda n: (0, 0)),           # final 1x1 weight
        ],
        out_specs=pl.BlockSpec((None, HW, PLANES), lambda n: (n, 0, 0)),
        compiler_params=pltpu.CompilerParams(
            dimension_semantics=("parallel",),
            vmem_limit_bytes=48 * 1024 * 1024),                     # < v7x 64 MiB, headroom
    )(patches, w_main, gap, kp["se_fc1"], kp["se_fc2"], kp["w_conv1"])

    out = out.reshape(N, H, W, PLANES)
    return jnp.transpose(out, (0, 3, 1, 2))                         # NHWC -> NCHW


# ----------------------------------------------------------------------------

if __name__ == "__main__":
    key = jax.random.PRNGKey(0)
    k_x, k_p = jax.random.split(key)

    N, Cin, H, W = 2, 4, 16, 16
    x = jax.random.normal(k_x, (N, Cin, H, W), jnp.float32)         # NCHW input
    params = make_params(Cin, k_p)

    fwd = jax.jit(inception_forward)
    out = fwd(x, params)
    out = jax.block_until_ready(out)

    assert out.shape == (N, 64, H, W), out.shape
    assert bool(jnp.all(jnp.isfinite(out)))
    print("KERNEL_OK")
</pallas_src>

<mosaic_0001>
module attributes {stable_mosaic.version = 11 : i64} {
  func.func @kernel(%arg0: i32, %arg1: memref<1x256x256xbf16, #tpu.memory_space<vmem>>, %arg2: memref<256x256xbf16, #tpu.memory_space<vmem>>, %arg3: memref<1x1x64xf32, #tpu.memory_space<vmem>>, %arg4: memref<320x20xf32, #tpu.memory_space<vmem>>, %arg5: memref<20x320xf32, #tpu.memory_space<vmem>>, %arg6: memref<320x64xf32, #tpu.memory_space<vmem>>, %arg7: memref<1x256x64xf32, #tpu.memory_space<vmem>>) attributes {dimension_semantics = [#tpu.dimension_semantics<parallel>], iteration_bounds = array<i64: 2>, scalar_prefetch = 0 : i64, scratch_operands = 0 : i64, tpu.core_type = #tpu.core_type<tc>, window_params = [{transform_indices = @transform_0, window_bounds = array<i64: 1, 256, 256>}, {pipeline_mode = #tpu.pipeline_mode<synchronous>, transform_indices = @transform_1, window_bounds = array<i64: 256, 256>}, {transform_indices = @transform_2, window_bounds = array<i64: 1, 1, 64>}, {pipeline_mode = #tpu.pipeline_mode<synchronous>, transform_indices = @transform_3, window_bounds = array<i64: 320, 20>}, {pipeline_mode = #tpu.pipeline_mode<synchronous>, transform_indices = @transform_4, window_bounds = array<i64: 20, 320>}, {pipeline_mode = #tpu.pipeline_mode<synchronous>, transform_indices = @transform_5, window_bounds = array<i64: 320, 64>}, {transform_indices = @transform_6, window_bounds = array<i64: 1, 256, 64>}]} {
    %c0 = arith.constant 0 : index
    %c0_0 = arith.constant 0 : index
    %c0_1 = arith.constant 0 : index
    %0 = vector.load %arg1[%c0, %c0_0, %c0_1] : memref<1x256x256xbf16, #tpu.memory_space<vmem>>, vector<1x256x256xbf16>
    %1 = vector.shape_cast %0 : vector<1x256x256xbf16> to vector<256x256xbf16>
    %c0_2 = arith.constant 0 : index
    %c0_3 = arith.constant 0 : index
    %2 = vector.load %arg2[%c0_2, %c0_3] : memref<256x256xbf16, #tpu.memory_space<vmem>>, vector<256x256xbf16>
    %cst = arith.constant dense<0.000000e+00> : vector<256x256xf32>
    %3 = tpu.matmul %1, %2, %cst {dimension_numbers = #tpu.dot_dimension_numbers<[1], [0], [0], [1], [0, 0, 1, 1], [], []>} : vector<256x256xbf16>, vector<256x256xbf16>, vector<256x256xf32> -> vector<256x256xf32>
    %cst_4 = arith.constant 0.000000e+00 : f32
    %4 = vector.broadcast %cst_4 : f32 to vector<256x256xf32>
    %5 = arith.maximumf %3, %4 : vector<256x256xf32>
    %c0_5 = arith.constant 0 : index
    %c0_6 = arith.constant 0 : index
    %c0_7 = arith.constant 0 : index
    %6 = vector.load %arg3[%c0_5, %c0_6, %c0_7] : memref<1x1x64xf32, #tpu.memory_space<vmem>>, vector<1x1x64xf32>
    %7 = vector.shape_cast %6 : vector<1x1x64xf32> to vector<1x64xf32>
    %cst_8 = arith.constant dense<0.000000e+00> : vector<256xf32>
    %8 = vector.multi_reduction <add>, %5, %cst_8 [0] : vector<256x256xf32> to vector<256xf32>
    %9 = vector.shape_cast %8 : vector<256xf32> to vector<1x256xf32>
    %cst_9 = arith.constant 2.560000e+02 : f32
    %10 = vector.broadcast %cst_9 : f32 to vector<1x256xf32>
    %11 = arith.divf %9, %10 : vector<1x256xf32>
    %c0_10 = arith.constant 0 : index
    %c0_11 = arith.constant 0 : index
    %12 = vector.load %arg4[%c0_10, %c0_11] : memref<320x20xf32, #tpu.memory_space<vmem>>, vector<256x20xf32>
    %cst_12 = arith.constant dense<0.000000e+00> : vector<1x20xf32>
    %13 = tpu.matmul %11, %12, %cst_12 {dimension_numbers = #tpu.dot_dimension_numbers<[1], [0], [0], [1], [0, 0, 1, 1], [], []>} : vector<1x256xf32>, vector<256x20xf32>, vector<1x20xf32> -> vector<1x20xf32>
    %c256 = arith.constant 256 : index
    %c0_13 = arith.constant 0 : index
    %14 = vector.load %arg4[%c256, %c0_13] : memref<320x20xf32, #tpu.memory_space<vmem>>, vector<64x20xf32>
    %cst_14 = arith.constant dense<0.000000e+00> : vector<1x20xf32>
    %15 = tpu.matmul %7, %14, %cst_14 {dimension_numbers = #tpu.dot_dimension_numbers<[1], [0], [0], [1], [0, 0, 1, 1], [], []>} : vector<1x64xf32>, vector<64x20xf32>, vector<1x20xf32> -> vector<1x20xf32>
    %16 = arith.addf %13, %15 : vector<1x20xf32>
    %cst_15 = arith.constant 0.000000e+00 : f32
    %17 = vector.broadcast %cst_15 : f32 to vector<1x20xf32>
    %18 = arith.maximumf %16, %17 : vector<1x20xf32>
    %c0_16 = arith.constant 0 : index
    %c0_17 = arith.constant 0 : index
    %19 = vector.load %arg5[%c0_16, %c0_17] : memref<20x320xf32, #tpu.memory_space<vmem>>, vector<20x320xf32>
    %cst_18 = arith.constant dense<0.000000e+00> : vector<1x320xf32>
    %20 = tpu.matmul %18, %19, %cst_18 {dimension_numbers = #tpu.dot_dimension_numbers<[1], [0], [0], [1], [0, 0, 1, 1], [], []>} : vector<1x20xf32>, vector<20x320xf32>, vector<1x320xf32> -> vector<1x320xf32>
    %21 = arith.negf %20 : vector<1x320xf32>
    %22 = math.exp %21 : vector<1x320xf32>
    %cst_19 = arith.constant 1.000000e+00 : f32
    %23 = vector.broadcast %cst_19 : f32 to vector<1x320xf32>
    %24 = arith.addf %23, %22 : vector<1x320xf32>
    %25 = arith.divf %23, %24 : vector<1x320xf32>
    %c0_20 = arith.constant 0 : index
    %c0_21 = arith.constant 0 : index
    %26 = vector.load %arg6[%c0_20, %c0_21] : memref<320x64xf32, #tpu.memory_space<vmem>>, vector<320x64xf32>
    %27 = vector.extract_strided_slice %26 {offsets = [0, 0], sizes = [256, 64], strides = [1, 1]} : vector<320x64xf32> to vector<256x64xf32>
    %28 = vector.extract_strided_slice %25 {offsets = [0, 0], sizes = [1, 256], strides = [1, 1]} : vector<1x320xf32> to vector<1x256xf32>
    %29 = tpu.transpose %28, [1, 0] : vector<1x256xf32> -> vector<256x1xf32>
    %30 = vector.broadcast %29 : vector<256x1xf32> to vector<256x64xf32>
    %31 = arith.mulf %27, %30 : vector<256x64xf32>
    %32 = vector.extract_strided_slice %26 {offsets = [256, 0], sizes = [64, 64], strides = [1, 1]} : vector<320x64xf32> to vector<64x64xf32>
    %33 = vector.extract_strided_slice %25 {offsets = [0, 256], sizes = [1, 64], strides = [1, 1]} : vector<1x320xf32> to vector<1x64xf32>
    %34 = tpu.transpose %33, [1, 0] : vector<1x64xf32> -> vector<64x1xf32>
    %35 = vector.broadcast %34 : vector<64x1xf32> to vector<64x64xf32>
    %36 = arith.mulf %32, %35 : vector<64x64xf32>
    %cst_22 = arith.constant dense<0.000000e+00> : vector<256x64xf32>
    %37 = tpu.matmul %5, %31, %cst_22 {dimension_numbers = #tpu.dot_dimension_numbers<[1], [0], [0], [1], [0, 0, 1, 1], [], []>} : vector<256x256xf32>, vector<256x64xf32>, vector<256x64xf32> -> vector<256x64xf32>
    %cst_23 = arith.constant dense<0.000000e+00> : vector<1x64xf32>
    %38 = tpu.matmul %7, %36, %cst_23 {dimension_numbers = #tpu.dot_dimension_numbers<[1], [0], [0], [1], [0, 0, 1, 1], [], []>} : vector<1x64xf32>, vector<64x64xf32>, vector<1x64xf32> -> vector<1x64xf32>
    %39 = vector.broadcast %38 : vector<1x64xf32> to vector<256x64xf32>
    %40 = arith.addf %37, %39 : vector<256x64xf32>
    %cst_24 = arith.constant 0.000000e+00 : f32
    %41 = vector.broadcast %cst_24 : f32 to vector<256x64xf32>
    %42 = arith.maximumf %40, %41 : vector<256x64xf32>
    %c0_25 = arith.constant 0 : index
    %c0_26 = arith.constant 0 : index
    %c0_27 = arith.constant 0 : index
    %43 = vector.load %arg7[%c0_25, %c0_26, %c0_27] : memref<1x256x64xf32, #tpu.memory_space<vmem>>, vector<1x256x64xf32>
    %44 = vector.shape_cast %43 : vector<1x256x64xf32> to vector<256x64xf32>
    %45 = vector.shape_cast %42 : vector<256x64xf32> to vector<1x256x64xf32>
    tpu.vector_store %arg7[%c0_25, %c0_26, %c0_27], %45 {strides = array<i32>} : memref<1x256x64xf32, #tpu.memory_space<vmem>>, vector<1x256x64xf32>,
    return
  }
  func.func @transform_0(%arg0: i32) -> (i32, i32, i32) {
    %c0_i32 = arith.constant 0 : i32
    %c0_i32_0 = arith.constant 0 : i32
    %c0_i32_1 = arith.constant 0 : i32
    return %arg0, %c0_i32, %c0_i32_0 : i32, i32, i32
  }
  func.func @transform_1(%arg0: i32) -> (i32, i32) {
    %c0_i32 = arith.constant 0 : i32
    %c0_i32_0 = arith.constant 0 : i32
    %c0_i32_1 = arith.constant 0 : i32
    return %c0_i32, %c0_i32_0 : i32, i32
  }
  func.func @transform_2(%arg0: i32) -> (i32, i32, i32) {
    %c0_i32 = arith.constant 0 : i32
    %c0_i32_0 = arith.constant 0 : i32
    %c0_i32_1 = arith.constant 0 : i32
    return %arg0, %c0_i32, %c0_i32_0 : i32, i32, i32
  }
  func.func @transform_3(%arg0: i32) -> (i32, i32) {
    %c0_i32 = arith.constant 0 : i32
    %c0_i32_0 = arith.constant 0 : i32
    %c0_i32_1 = arith.constant 0 : i32
    return %c0_i32, %c0_i32_0 : i32, i32
  }
  func.func @transform_4(%arg0: i32) -> (i32, i32) {
    %c0_i32 = arith.constant 0 : i32
    %c0_i32_0 = arith.constant 0 : i32
    %c0_i32_1 = arith.constant 0 : i32
    return %c0_i32, %c0_i32_0 : i32, i32
  }
  func.func @transform_5(%arg0: i32) -> (i32, i32) {
    %c0_i32 = arith.constant 0 : i32
    %c0_i32_0 = arith.constant 0 : i32
    %c0_i32_1 = arith.constant 0 : i32
    return %c0_i32, %c0_i32_0 : i32, i32
  }
  func.func @transform_6(%arg0: i32) -> (i32, i32, i32) {
    %c0_i32 = arith.constant 0 : i32
    %c0_i32_0 = arith.constant 0 : i32
    %c0_i32_1 = arith.constant 0 : i32
    return %arg0, %c0_i32, %c0_i32_0 : i32, i32, i32
  }
}

</mosaic_0001>

<bundles_post_ra>
// kernel: inception_forward.1
= control target key start
LH: loop header
LB: loop body
LE: loop exit
PB: predicated region body
PF: predicated region fallthrough
CT: control target
= control target key end

     0   :  { %11 = vsyncpa [#allocation3], 0  ;;  %s4516_s0 = inlined_call_operand.vmem [shape: bf16[2,256,256], index: 0, kind: input, shape index: {}]   ;;  %s4517_s1 = inlined_call_operand.vmem [shape: bf16[256,256], index: 1, kind: input, shape index: {}]   ;;  %s4518_s2 = inlined_call_operand.vmem [shape: f32[2,1,64], index: 2, kind: input, shape index: {}]   ;;  %s4519_s3 = inlined_call_operand.vmem [shape: f32[320,20], index: 3, kind: input, shape index: {}]   ;;  %s4520_s4 = inlined_call_operand.vmem [shape: f32[20,320], index: 4, kind: input, shape index: {}]   ;;  %s4521_s5 = inlined_call_operand.vmem [shape: f32[320,64], index: 5, kind: input, shape index: {}]   ;;  %s4522_s6 = inlined_call_operand.hbm [shape: f32[2,256,64], index: 6, kind: output, shape index: {}]  }
   0x1   :  { %13 = vsyncpa [#allocation3 + $0x1], 0  ;;  %s2697_s21 = smov 0   ;;  %s2699_s22 = smov 0  }
   0x2   :  { %s2701_s23 = smov 0   ;;  %s2703_s24 = smov 0  }
   0x3 LB: > { %s2718_s25 = sadd.s32 4294967295, %s2656_s24   ;;  %s2171_s26 = sadd.s32 4294967294, %s2656_s24   ;;  %s2656_s24 = sphi %s2703_s24, %s4820_s24   ;;  %s2652_s23 = sphi %s2701_s23, %s4819_s23   ;;  %s2648_s22 = sphi %s2699_s22, %s4818_s22   ;;  %s2644_s21 = sphi %s2697_s21, %s4817_s21  }
   0x4   : > { %s2722_s27 = sadd.s32 1, %s2656_s24   ;;  %s162_s28 = sadd.s32 1, %s2652_s23 }
   0x5   : > { %s159_s29 = ssub.s32 %s2656_s24, %s2722_s27  ;;  %p172_p0 = scmp.ne.s32.totalorder %s2652_s23, %s2648_s22 }
   0x6   : > { %p160_p1 = scmp.eq.s32.totalorder %s159_s29, 0  ;;  %p173_p2 = scmp.eq.s32.totalorder %s2718_s25, 1 }
   0x7   : > { %p178_p3 = scmp.ne.s32.totalorder %s2648_s22, %s2644_s21  ;;  %p179_p4 = scmp.eq.s32.totalorder %s2171_s26, 1 }
   0x8   : > { %s2733_s30 = scalar_select %p160_p1, %s2652_s23, %s162_s28  }
   0x9   : > { %p2735_p5 = por %p173_p2, %p172_p0  ;;  %p2739_p6 = por %p179_p4, %p178_p3 }
   0xa   : > { %p2174_p7 = scmp.ge.s32.totalorder %s2656_s24, 1  ;;  %p223_p8 = scmp.lt.s32.totalorder %s2656_s24, 3 }
   0xc   : > { %p224_p9 = pnand %p2174_p7, %p223_p8 }
   0xe   : > { %227 = sbr.rel (%p224_p9) target bundleno = 1855 (0x73f), region = 44 }
  0x13   : > { %v2364_v0 = vld [vmem:[%s4517_s1 + $0x70] sm:$0xf]  ;;  %v2498_v1 = vld [vmem:[%s4517_s1 + $0x74] sm:$0xf0]  ;;  %v2497_v2 = vld [vmem:[%s4517_s1 + $0x74] sm:$0xf] }
  0x14   : > { %v2365_v3 = vor.u32 %v2498_v1, %v2364_v0  ;;  %v2366_v4 = vld [vmem:[%s4517_s1 + $0x78] sm:$0xf0]  ;;  %v2356_v5 = vld [vmem:[%s4517_s1 + $0x60] sm:$0xf]  ;;  %v2496_v6 = vld [vmem:[%s4517_s1 + $0x64] sm:$0xf0] }
  0x15   : > { %v2369_v7 = vor.u32 %v2497_v2, %v2366_v4  ;;  %v2495_v8 = vld [vmem:[%s4517_s1 + $0x64] sm:$0xf]  ;;  %v2358_v9 = vld [vmem:[%s4517_s1 + $0x68] sm:$0xf0]  ;;  %v2357_v10 = vor.u32 %v2496_v6, %v2356_v5  ;;  %v2348_v12 = vld [vmem:[%s4517_s1 + $0x50] sm:$0xf] }
  0x16   : > { %2516 = vmatpush.bf16.msra.mxu1 %v2365_v3  ;;  %648 = vmatpush.bf16.msra.mxu0 %v2365_v3  ;;  %v2361_v11 = vor.u32 %v2495_v8, %v2358_v9  ;;  %v2494_v13 = vld [vmem:[%s4517_s1 + $0x54] sm:$0xf0]  ;;  %v2493_v14 = vld [vmem:[%s4517_s1 + $0x54] sm:$0xf]  ;;  %v2350_v15 = vld [vmem:[%s4517_s1 + $0x58] sm:$0xf0] }
  0x17   : > { %826 = vmatpush.bf16.msra.mxu2 %v2369_v7  ;;  %v2349_v16 = vor.u32 %v2494_v13, %v2348_v12  ;;  %v2353_v17 = vor.u32 %v2493_v14, %v2350_v15  ;;  %v2340_v18 = vld [vmem:[%s4517_s1 + $0x40] sm:$0xf]  ;;  %v2492_v19 = vld [vmem:[%s4517_s1 + $0x44] sm:$0xf0]  ;;  %v2491_v20 = vld [vmem:[%s4517_s1 + $0x44] sm:$0xf] }
  0x18   : > { %v2342_v21 = vld [vmem:[%s4517_s1 + $0x48] sm:$0xf0]  ;;  %v2341_v22 = vor.u32 %v2492_v19, %v2340_v18  ;;  %v2513_v23 = vld [vmem:[%s4517_s1 + $0xf4] sm:$0xf]  ;;  %v2430_v24 = vld [vmem:[%s4517_s1 + $0xf8] sm:$0xf0] }
  0x19   : > { %v2345_v25 = vor.u32 %v2491_v20, %v2342_v21  ;;  %v2332_v26 = vld [vmem:[%s4517_s1 + $0x30] sm:$0xf]  ;;  %v2490_v27 = vld [vmem:[%s4517_s1 + $0x34] sm:$0xf0]  ;;  %v2433_v28 = vor.u32 %v2513_v23, %v2430_v24  ;;  %v2489_v29 = vld [vmem:[%s4517_s1 + $0x34] sm:$0xf] }
  0x1a   : > { %2517 = vmatpush.bf16.msra.mxu1 %v2357_v10  ;;  %649 = vmatpush.bf16.msra.mxu0 %v2357_v10  ;;  %v2334_v30 = vld [vmem:[%s4517_s1 + $0x38] sm:$0xf0]  ;;  %p256_p10 = scmp.lt.s32.totalorder %s2718_s25, 1  ;;  %v2333_v31 = vor.u32 %v2490_v27, %v2332_v26  ;;  %v2324_v33 = vld [vmem:[%s4517_s1 + $0x20] sm:$0xf]  ;;  %vm1192_vm0 = vcmask 523264  }
  0x1b   : > { %827 = vmatpush.bf16.msra.mxu2 %v2361_v11  ;;  %2524 = vmatpush.bf16.msra.mxu3 %v2433_v28  ;;  %v2337_v32 = vor.u32 %v2489_v29, %v2334_v30  ;;  %v2488_v34 = vld [vmem:[%s4517_s1 + $0x24] sm:$0xf0]  ;;  %v2487_v35 = vld [vmem:[%s4517_s1 + $0x24] sm:$0xf]  ;;  %v2326_v36 = vld [vmem:[%s4517_s1 + $0x28] sm:$0xf0] }
  0x1c   : > { %s2825_s16 = scalar_select %p256_p10, %s2718_s25, 1  ;;  %v2325_v37 = vor.u32 %v2488_v34, %v2324_v33  ;;  %v2329_v38 = vor.u32 %v2487_v35, %v2326_v36  ;;  %v2316_v39 = vld [vmem:[%s4517_s1 + $0x10] sm:$0xf]  ;;  %v2486_v40 = vld [vmem:[%s4517_s1 + $0x14] sm:$0xf0]  ;;  %vm1270_vm2 = vcmask 1043456  }
  0x1d   : > { %v2485_v41 = vld [vmem:[%s4517_s1 + $0x14] sm:$0xf]  ;;  %v2318_v42 = vld [vmem:[%s4517_s1 + $0x18] sm:$0xf0]  ;;  %v2317_v43 = vor.u32 %v2486_v40, %v2316_v39  ;;  %v2308_v45 = vld [vmem:[%s4517_s1] sm:$0xf] }
  0x1e   : > { %2518 = vmatpush.bf16.msra.mxu1 %v2349_v16  ;;  %650 = vmatpush.bf16.msra.mxu0 %v2349_v16  ;;  %s2450_s10 = sshll.u32 %s2825_s16, 8  ;;  %v2321_v44 = vor.u32 %v2485_v41, %v2318_v42  ;;  %v2484_v46 = vld [vmem:[%s4517_s1 + $0x4] sm:$0xf0]  ;;  %v2483_v47 = vld [vmem:[%s4517_s1 + $0x4] sm:$0xf]  ;;  %vm1266_vm3 = vcmask 162816  }
  0x1f   : > { %828 = vmatpush.bf16.msra.mxu2 %v2353_v17  ;;  %s2849_s18 = scalar_lea.vmem %s4516_s0, %s2450_s10  ;;  %v2310_v48 = vld [vmem:[%s4517_s1 + $0x8] sm:$0xf0]  ;;  %v2309_v49 = vor.u32 %v2484_v46, %v2308_v45  ;;  %v2511_v57 = vld [vmem:[%s4517_s1 + $0xe4] sm:$0xf]  ;;  %v2428_v59 = vld [vmem:[%s4517_s1 + $0xf0] sm:$0xf]  ;;  %s3634_s10 = scalar_lea.vmem %s4518_s2, %s2825_s16 }
  0x20   : > { %v2244_v50 = vld [vmem:[%s2849_s18 + $0x80] sm:$0xf]  ;;  %v2468_v51 = vld [vmem:[%s2849_s18 + $0x84] sm:$0xf0]  ;;  %v2313_v52 = vor.u32 %v2483_v47, %v2310_v48  ;;  %v2422_v58 = vld [vmem:[%s4517_s1 + $0xe8] sm:$0xf0] }
  0x21   : > { %v2180_v53 = vld [vmem:[%s2849_s18] sm:$0xf]  ;;  %v2452_v54 = vld [vmem:[%s2849_s18 + $0x4] sm:$0xf0]  ;;  %v2861_v55 = vor.u32 %v2468_v51, %v2244_v50  ;;  %v2425_v60 = vor.u32 %v2511_v57, %v2422_v58  ;;  %v2514_v61 = vld [vmem:[%s4517_s1 + $0xf4] sm:$0xf0] }
  0x22   : > { %2519 = vmatpush.bf16.msra.mxu1 %v2341_v22  ;;  %651 = vmatpush.bf16.msra.mxu0 %v2341_v22  ;;  %v2181_v56 = vor.u32 %v2452_v54, %v2180_v53  ;;  %v2429_v62 = vor.u32 %v2514_v61, %v2428_v59  ;;  %v2252_v63 = vld [vmem:[%s2849_s18 + $0x90] sm:$0xf]  ;;  %v2470_v0 = vld [vmem:[%s2849_s18 + $0x94] sm:$0xf0]  ;;  %v2420_v5 = vld [vmem:[%s4517_s1 + $0xe0] sm:$0xf] }
  0x23   : > { %829 = vmatpush.bf16.msra.mxu2 %v2345_v25  ;;  %2525 = vmatpush.bf16.msra.mxu3 %v2425_v60  ;;  %v2188_v1 = vld [vmem:[%s2849_s18 + $0x10] sm:$0xf]  ;;  %v2454_v2 = vld [vmem:[%s2849_s18 + $0x14] sm:$0xf0]  ;;  %v2880_v3 = vor.u32 %v2470_v0, %v2252_v63  ;;  %v2512_v6 = vld [vmem:[%s4517_s1 + $0xe4] sm:$0xf0] }
  0x24   : > { %v2189_v4 = vor.u32 %v2454_v2, %v2188_v1  ;;  %v2421_v7 = vor.u32 %v2512_v6, %v2420_v5  ;;  %v2260_v8 = vld [vmem:[%s2849_s18 + $0xa0] sm:$0xf]  ;;  %v2472_v9 = vld [vmem:[%s2849_s18 + $0xa4] sm:$0xf0]  ;;  %v2509_v14 = vld [vmem:[%s4517_s1 + $0xd4] sm:$0xf] }
  0x25   : > { %v2196_v10 = vld [vmem:[%s2849_s18 + $0x20] sm:$0xf]  ;;  %v2456_v11 = vld [vmem:[%s2849_s18 + $0x24] sm:$0xf0]  ;;  %v2893_v12 = vor.u32 %v2472_v9, %v2260_v8  ;;  %v2414_v15 = vld [vmem:[%s4517_s1 + $0xd8] sm:$0xf0] }
  0x26   : > { %2520 = vmatpush.bf16.msra.mxu1 %v2333_v31  ;;  %652 = vmatpush.bf16.msra.mxu0 %v2333_v31  ;;  %v2197_v13 = vor.u32 %v2456_v11, %v2196_v10  ;;  %v2412_v16 = vld [vmem:[%s4517_s1 + $0xd0] sm:$0xf]  ;;  %v2417_v17 = vor.u32 %v2509_v14, %v2414_v15  ;;  %v2510_v18 = vld [vmem:[%s4517_s1 + $0xd4] sm:$0xf0]  ;;  %v2404_v26 = vld [vmem:[%s4517_s1 + $0xc0] sm:$0xf] }
  0x27   : > { %830 = vmatpush.bf16.msra.mxu2 %v2337_v32  ;;  %v2413_v19 = vor.u32 %v2510_v18, %v2412_v16  ;;  %v2268_v20 = vld [vmem:[%s2849_s18 + $0xb0] sm:$0xf]  ;;  %v2474_v21 = vld [vmem:[%s2849_s18 + $0xb4] sm:$0xf0]  ;;  %v2508_v27 = vld [vmem:[%s4517_s1 + $0xc4] sm:$0xf0] }
  0x28   : > { %2526 = vmatpush.bf16.msra.mxu3 %v2417_v17  ;;  %v2204_v22 = vld [vmem:[%s2849_s18 + $0x30] sm:$0xf]  ;;  %v2458_v23 = vld [vmem:[%s2849_s18 + $0x34] sm:$0xf0]  ;;  %v2912_v24 = vor.u32 %v2474_v21, %v2268_v20  ;;  %v2276_v29 = vld [vmem:[%s2849_s18 + $0xc0] sm:$0xf] }
  0x29   : > { %v2205_v25 = vor.u32 %v2458_v23, %v2204_v22  ;;  %v2476_v30 = vld [vmem:[%s2849_s18 + $0xc4] sm:$0xf0]  ;;  %v2212_v31 = vld [vmem:[%s2849_s18 + $0x40] sm:$0xf]  ;;  %v2507_v35 = vld [vmem:[%s4517_s1 + $0xc4] sm:$0xf] }
  0x2a   : > { %2521 = vmatpush.bf16.msra.mxu1 %v2325_v37  ;;  %653 = vmatpush.bf16.msra.mxu0 %v2325_v37  ;;  %v2460_v32 = vld [vmem:[%s2849_s18 + $0x44] sm:$0xf0]  ;;  %v2925_v33 = vor.u32 %v2476_v30, %v2276_v29  ;;  %v2406_v36 = vld [vmem:[%s4517_s1 + $0xc8] sm:$0xf0]  ;;  %v2396_v37 = vld [vmem:[%s4517_s1 + $0xb0] sm:$0xf] }
  0x2b   : > { %831 = vmatpush.bf16.msra.mxu2 %v2329_v38  ;;  %v2213_v34 = vor.u32 %v2460_v32, %v2212_v31  ;;  %v2409_v38 = vor.u32 %v2507_v35, %v2406_v36  ;;  %v2506_v39 = vld [vmem:[%s4517_s1 + $0xb4] sm:$0xf0]  ;;  %v2284_v41 = vld [vmem:[%s2849_s18 + $0xd0] sm:$0xf]  ;;  %v2505_v47 = vld [vmem:[%s4517_s1 + $0xb4] sm:$0xf] }
  0x2c   : > { %v2397_v40 = vor.u32 %v2506_v39, %v2396_v37  ;;  %v2478_v42 = vld [vmem:[%s2849_s18 + $0xd4] sm:$0xf0]  ;;  %v2398_v48 = vld [vmem:[%s4517_s1 + $0xb8] sm:$0xf0]  ;;  %v2388_v50 = vld [vmem:[%s4517_s1 + $0xa0] sm:$0xf] }
  0x2d   : > { %2527 = vmatpush.bf16.msra.mxu3 %v2409_v38  ;;  %v2944_v45 = vor.u32 %v2478_v42, %v2284_v41  ;;  %v2504_v51 = vld [vmem:[%s4517_s1 + $0xa4] sm:$0xf0]  ;;  %v2390_v54 = vld [vmem:[%s4517_s1 + $0xa8] sm:$0xf0]  ;;  %v2502_v57 = vld [vmem:[%s4517_s1 + $0x94] sm:$0xf0] }
  0x2e   : > { %2522 = vmatpush.bf16.msra.mxu1 %v2317_v43  ;;  %654 = vmatpush.bf16.msra.mxu0 %v2317_v43  ;;  %v2220_v43 = vld [vmem:[%s2849_s18 + $0x50] sm:$0xf]  ;;  %v2389_v53 = vor.u32 %v2504_v51, %v2388_v50  ;;  %v2501_v59 = vld [vmem:[%s4517_s1 + $0x94] sm:$0xf]  ;;  %v2292_v63 = vld [vmem:[%s2849_s18 + $0xe0] sm:$0xf] }
  0x2f   : > { %832 = vmatpush.bf16.msra.mxu2 %v2321_v44  ;;  %v2462_v44 = vld [vmem:[%s2849_s18 + $0x54] sm:$0xf0]  ;;  %v2480_v0 = vld [vmem:[%s2849_s18 + $0xe4] sm:$0xf0]  ;;  %v2228_v1 = vld [vmem:[%s2849_s18 + $0x60] sm:$0xf] }
  0x30   : > { %v2221_v46 = vor.u32 %v2462_v44, %v2220_v43  ;;  %v2464_v2 = vld [vmem:[%s2849_s18 + $0x64] sm:$0xf0]  ;;  %v2499_v6 = vld [vmem:[%s4517_s1 + $0x84] sm:$0xf]  ;;  %v2374_v9 = vld [vmem:[%s4517_s1 + $0x88] sm:$0xf0] }
  0x31   : > { %v2500_v5 = vld [vmem:[%s4517_s1 + $0x84] sm:$0xf0]  ;;  %v2229_v10 = vor.u32 %v2464_v2, %v2228_v1  ;;  %v2377_v11 = vor.u32 %v2499_v6, %v2374_v9  ;;  %v2246_v14 = vld [vmem:[%s2849_s18 + $0x88] sm:$0xf0]  ;;  %v2300_v16 = vld [vmem:[%s2849_s18 + $0xf0] sm:$0xf] }
  0x32   : > { %2523 = vmatpush.bf16.msra.mxu1 %v2309_v49  ;;  %655 = vmatpush.bf16.msra.mxu0 %v2309_v49  ;;  %v2401_v49 = vor.u32 %v2505_v47, %v2398_v48  ;;  %v2236_v18 = vld [vmem:[%s2849_s18 + $0x70] sm:$0xf]  ;;  %v2469_v22 = vld [vmem:[%s2849_s18 + $0x94] sm:$0xf]  ;;  %v2254_v23 = vld [vmem:[%s2849_s18 + $0x98] sm:$0xf0] }
  0x33   : > { %833 = vmatpush.bf16.msra.mxu2 %v2313_v52  ;;  %v2503_v52 = vld [vmem:[%s4517_s1 + $0xa4] sm:$0xf]  ;;  %v2262_v31 = vld [vmem:[%s2849_s18 + $0xa8] sm:$0xf0]  ;;  %v2453_v36 = vld [vmem:[%s2849_s18 + $0x14] sm:$0xf] }
  0x34   : > { %2528 = vmatpush.bf16.msra.mxu3 %v2401_v49  ;;  %v2393_v58 = vor.u32 %v2503_v52, %v2390_v54  ;;  %v2471_v30 = vld [vmem:[%s2849_s18 + $0xa4] sm:$0xf]  ;;  %v2190_v37 = vld [vmem:[%s2849_s18 + $0x18] sm:$0xf0]  ;;  %v2473_v41 = vld [vmem:[%s2849_s18 + $0xb4] sm:$0xf] }
  0x35   : > { %696 = vmatmul.bf16.vlgmr.msra.gmra.mxu1 %v2861_v55  ;;  %656 = vmatmul.bf16.vlgmr.msra.gmra.mxu0 %v2181_v56  ;;  %v3021_v32 = vor.u32 %v2471_v30, %v2262_v31  ;;  %v3034_v39 = vor.u32 %v2453_v36, %v2190_v37  ;;  %v2198_v47 = vld [vmem:[%s2849_s18 + $0x28] sm:$0xf0]  ;;  %v2475_v51 = vld [vmem:[%s2849_s18 + $0xc4] sm:$0xf]  ;;  %s2614_s16 = scalar_lea.hbm %s4522_s6, 512 }
  0x36   : > { %834 = vmatmul.bf16.vlgmr.msra.gmra.mxu2 %v2181_v56  ;;  %737 = vmatpush.bf16.msrb.mxu1 %v2429_v62  ;;  %v2380_v56 = vld [vmem:[%s4517_s1 + $0x90] sm:$0xf]  ;;  %v2459_v1 = vld [vmem:[%s2849_s18 + $0x44] sm:$0xf]  ;;  %v2214_v2 = vld [vmem:[%s2849_s18 + $0x48] sm:$0xf0] }
  0x37   : > { %915 = vmatpush.bf16.msrb.mxu2 %v2433_v28  ;;  %v2405_v28 = vor.u32 %v2508_v27, %v2404_v26  ;;  %v2381_v61 = vor.u32 %v2502_v57, %v2380_v56  ;;  %v2451_v26 = vld [vmem:[%s2849_s18 + $0x4] sm:$0xf]  ;;  %v2182_v27 = vld [vmem:[%s2849_s18 + $0x8] sm:$0xf0]  ;;  %v2457_v56 = vld [vmem:[%s2849_s18 + $0x34] sm:$0xf] }
  0x38   : > { %2529 = vmatpush.bf16.msra.mxu3 %v2393_v58  ;;  %v2206_v57 = vld [vmem:[%s2849_s18 + $0x38] sm:$0xf0] }
  0x3a   : > { %738 = vmatpush.bf16.msrb.mxu1 %v2421_v7  ;;  %v2990_v7 = vor.u32 %v2480_v0, %v2292_v63 }
  0x3b   : > { %916 = vmatpush.bf16.msrb.mxu2 %v2425_v60  ;;  %v2382_v60 = vld [vmem:[%s4517_s1 + $0x98] sm:$0xf0] }
  0x3c   : > { %v2385_v62 = vor.u32 %v2501_v59, %v2382_v60  ;;  %v3072_v59 = vor.u32 %v2457_v56, %v2206_v57 }
  0x3e   : > { %739 = vmatpush.bf16.msrb.mxu1 %v2413_v19  ;;  %2530 = vmatpush.bf16.msra.mxu3 %v2385_v62  ;;  %v2466_v19 = vld [vmem:[%s2849_s18 + $0x74] sm:$0xf0] }
  0x3f   : > { %917 = vmatpush.bf16.msrb.mxu2 %v2417_v17  ;;  %v2482_v17 = vld [vmem:[%s2849_s18 + $0xf4] sm:$0xf0]  ;;  %v2237_v21 = vor.u32 %v2466_v19, %v2236_v18  ;;  %v2481_v19 = vld [vmem:[%s2849_s18 + $0xf4] sm:$0xf] }
  0x40   : > { %v3005_v20 = vor.u32 %v2482_v17, %v2300_v16 }
  0x42   : > { %740 = vmatpush.bf16.msrb.mxu1 %v2405_v28  ;;  %2531 = vmatpush.bf16.msra.mxu3 %v2377_v11  ;;  %v3015_v28 = vor.u32 %v2451_v26, %v2182_v27  ;;  %v2463_v26 = vld [vmem:[%s2849_s18 + $0x64] sm:$0xf]  ;;  %v2230_v27 = vld [vmem:[%s2849_s18 + $0x68] sm:$0xf0] }
  0x43   : > { %918 = vmatpush.bf16.msrb.mxu2 %v2409_v38  ;;  %v3129_v31 = vor.u32 %v2463_v26, %v2230_v27 }
  0x45   : > { %701 = vmatmul.bf16.gmra.mxu1 %v2880_v3  ;;  %661 = vmatmul.bf16.gmra.mxu0 %v2189_v4 }
  0x46   : > { %839 = vmatmul.bf16.gmra.mxu2 %v2189_v4  ;;  %741 = vmatpush.bf16.msrb.mxu1 %v2397_v40  ;;  %v2372_v4 = vld [vmem:[%s4517_s1 + $0x80] sm:$0xf] }
  0x47   : > { %919 = vmatpush.bf16.msrb.mxu2 %v2401_v49  ;;  %v2373_v8 = vor.u32 %v2500_v5, %v2372_v4  ;;  %v3091_v5 = vor.u32 %v2459_v1, %v2214_v2 }
  0x4a   : > { %742 = vmatpush.bf16.msrb.mxu1 %v2389_v53 }
  0x4b   : > { %920 = vmatpush.bf16.msrb.mxu2 %v2393_v58 }
  0x4e   : > { %743 = vmatpush.bf16.msrb.mxu1 %v2381_v61  ;;  %v2477_v61 = vld [vmem:[%s2849_s18 + $0xd4] sm:$0xf] }
  0x4f   : > { %921 = vmatpush.bf16.msrb.mxu2 %v2385_v62 }
  0x52   : > { %744 = vmatpush.bf16.msrb.mxu1 %v2373_v8  ;;  %v2479_v8 = vld [vmem:[%s2849_s18 + $0xe4] sm:$0xf] }
  0x53   : > { %922 = vmatpush.bf16.msrb.mxu2 %v2377_v11 }
  0x55   : > { %706 = vmatmul.bf16.gmra.mxu1 %v2893_v12  ;;  %666 = vmatmul.bf16.gmra.mxu0 %v2197_v13 }
  0x56   : > { %844 = vmatmul.bf16.gmra.mxu2 %v2197_v13  ;;  %v2467_v13 = vld [vmem:[%s2849_s18 + $0x84] sm:$0xf] }
  0x57   : > { %v2997_v15 = vor.u32 %v2467_v13, %v2246_v14  ;;  %v2461_v13 = vld [vmem:[%s2849_s18 + $0x54] sm:$0xf]  ;;  %v2222_v14 = vld [vmem:[%s2849_s18 + $0x58] sm:$0xf0] }
  0x58   : > { %v3110_v17 = vor.u32 %v2461_v13, %v2222_v14  ;;  %v1166_v13 = vld [vmem:[%s4519_s3 + $0x70] sm:$0xff] }
  0x59   : > { %963 = vmatmul.bf16.vlgmr.msra.gmra.mxu3 %v2997_v15 }
  0x65   : > { %711 = vmatmul.bf16.gmra.mxu1 %v2912_v24  ;;  %671 = vmatmul.bf16.gmra.mxu0 %v2205_v25 }
  0x66   : > { %849 = vmatmul.bf16.gmra.mxu2 %v2205_v25  ;;  %v3009_v25 = vor.u32 %v2469_v22, %v2254_v23 }
  0x69   : > { %968 = vmatmul.bf16.gmra.mxu3 %v3009_v25 }
  0x75   : > { %716 = vmatmul.bf16.gmra.mxu1 %v2925_v33  ;;  %676 = vmatmul.bf16.gmra.mxu0 %v2213_v34 }
  0x76   : > { %854 = vmatmul.bf16.gmra.mxu2 %v2213_v34 }
  0x79   : > { %973 = vmatmul.bf16.gmra.mxu3 %v3021_v32 }
  0x85   : > { %721 = vmatmul.bf16.gmra.mxu1 %v2944_v45  ;;  %681 = vmatmul.bf16.gmra.mxu0 %v2221_v46 }
  0x86   : > { %859 = vmatmul.bf16.gmra.mxu2 %v2221_v46  ;;  %v2455_v46 = vld [vmem:[%s2849_s18 + $0x24] sm:$0xf] }
  0x87   : > { %v3053_v49 = vor.u32 %v2455_v46, %v2198_v47 }
  0x95   : > { %726 = vmatmul.bf16.gmra.mxu1 %v2990_v7  ;;  %686 = vmatmul.bf16.gmra.mxu0 %v2229_v10 }
  0x96   : > { %864 = vmatmul.bf16.gmra.mxu2 %v2229_v10 }
  0xa5   : > { %731 = vmatmul.bf16.gmra.mxu1 %v3005_v20  ;;  %691 = vmatmul.bf16.gmra.mxu0 %v2237_v21 }
  0xa6   : > { %869 = vmatmul.bf16.gmra.mxu2 %v2237_v21  ;;  %v2302_v21 = vld [vmem:[%s2849_s18 + $0xf8] sm:$0xf0] }
  0xb2   : > { %v3017_v29 = vpop.f32.mrf.mxu1  ;;  %v3202_v26 = vpop.f32.mrf.mxu0 }
  0xb5   : > { %745 = vmatmul.bf16.vlgmr.msrb.gmra.mxu1 %v3015_v28 }
  0xb6   : > { %874 = vmatmul.bf16.gmra.mxu2 %v2861_v55  ;;  %v2270_v55 = vld [vmem:[%s2849_s18 + $0xb8] sm:$0xf0] }
  0xb7   : > { %v3040_v42 = vor.u32 %v2473_v41, %v2270_v55  ;;  %v2465_v41 = vld [vmem:[%s2849_s18 + $0x74] sm:$0xf]  ;;  %v2238_v55 = vld [vmem:[%s2849_s18 + $0x78] sm:$0xf0] }
  0xb8   : > { %v3143_v47 = vor.u32 %v2465_v41, %v2238_v55 }
  0xb9   : > { %v3026_v34 = vpop.f32.mrf.mxu2  ;;  %978 = vmatmul.bf16.gmra.mxu3 %v3040_v42 }
  0xba   : > { %v3028_v35 = vpop.f32.mrf.mxu1 }
  0xc1   : > { %v3032_v38 = vpop.f32.mrf.mxu2 }
  0xc2   : > { %v3036_v40 = vpop.f32.mrf.mxu1 }
  0xc5   : > { %750 = vmatmul.bf16.gmra.mxu1 %v3034_v39 }
  0xc6   : > { %879 = vmatmul.bf16.gmra.mxu2 %v2880_v3  ;;  %v2278_v3 = vld [vmem:[%s2849_s18 + $0xc8] sm:$0xf0] }
  0xc7   : > { %v3059_v52 = vor.u32 %v2475_v51, %v2278_v3 }
  0xc9   : > { %v3045_v43 = vpop.f32.mrf.mxu2  ;;  %983 = vmatmul.bf16.gmra.mxu3 %v3059_v52 }
  0xca   : > { %v3047_v44 = vpop.f32.mrf.mxu1 }
  0xd1   : > { %v3051_v48 = vpop.f32.mrf.mxu2 }
  0xd2   : > { %v3055_v50 = vpop.f32.mrf.mxu1 }
  0xd5   : > { %755 = vmatmul.bf16.gmra.mxu1 %v3053_v49 }
  0xd6   : > { %884 = vmatmul.bf16.gmra.mxu2 %v2893_v12  ;;  %v2286_v12 = vld [vmem:[%s2849_s18 + $0xd8] sm:$0xf0] }
  0xd7   : > { %v3078_v62 = vor.u32 %v2477_v61, %v2286_v12 }
  0xd9   : > { %v3064_v53 = vpop.f32.mrf.mxu2  ;;  %988 = vmatmul.bf16.gmra.mxu3 %v3078_v62 }
  0xda   : > { %v3066_v54 = vpop.f32.mrf.mxu1 }
  0xe1   : > { %v3070_v58 = vpop.f32.mrf.mxu2 }
  0xe2   : > { %v3074_v60 = vpop.f32.mrf.mxu1 }
  0xe5   : > { %760 = vmatmul.bf16.gmra.mxu1 %v3072_v59 }
  0xe6   : > { %889 = vmatmul.bf16.gmra.mxu2 %v2912_v24  ;;  %v2294_v24 = vld [vmem:[%s2849_s18 + $0xe8] sm:$0xf0]  ;;  %s2515_s18 = sshll.u32 %s2718_s25, 8 }
  0xe7   : > { %v3097_v9 = vor.u32 %v2479_v8, %v2294_v24  ;;  %s2096_s20 = scalar_lea.hbm %s4522_s6, %s2515_s18 }
  0xe8   : > { %s2099_s28 = sshll.u32 %s2096_s20, 4  ;;  %s2100_s28 = int_to_ptr.hbm [resolvable:$true] %s2099_s28 }
  0xe9   : > { %v3083_v63 = vpop.f32.mrf.mxu2  ;;  %993 = vmatmul.bf16.gmra.mxu3 %v3097_v9  ;;  %s2608_s29 = sshra.s32 %s2100_s28, 4  ;;  %s2609_s29 = int_to_ptr.hbm [resolvable:$true] %s2608_s29 }
  0xea   : > { %4613 = vst [vmem:[#allocation5_spill] sm:$0xff] %v3083_v63  ;;  %v3085_v0 = vpop.f32.mrf.mxu1  ;;  %s2610_s9 = scalar_lea.hbm %s2609_s29, 256  ;;  %p2615_p0 = scmp.lt.s32.totalorder %s2609_s29, %s4522_s6 }
  0xeb   : > { %p2611_p11 = scmp.ne.s32.totalorder %s2609_s29, %s2610_s9  ;;  %p2616_p1 = scmp.lt.s32.totalorder %s2614_s16, %s2610_s9 }
  0xed   : > { %p2612_p12 = pnand %p2611_p11, %p2735_p5  ;;  %p2617_p2 = por %p2616_p1, %p2615_p0 }
  0xef   : > { %p2613_p13 = pneg %p2612_p12 }
  0xf1   : > { %v3089_v4 = vpop.f32.mrf.mxu2  ;;  %p2618_p3 = pnand %p2617_p2, %p2613_p13 }
  0xf2   : > { %4614 = vst [vmem:[#allocation6_spill] sm:$0xff] %v3089_v4  ;;  %v3093_v6 = vpop.f32.mrf.mxu1 }
  0xf5   : > { %765 = vmatmul.bf16.gmra.mxu1 %v3091_v5 }
  0xf6   : > { %894 = vmatmul.bf16.gmra.mxu2 %v2925_v33  ;;  %v3116_v33 = vor.u32 %v2481_v19, %v2302_v21  ;;  %v1165_v21 = vld [vmem:[%s4519_s3 + $0x68] sm:$0xff] }
  0xf9   : > { %v3102_v10 = vpop.f32.mrf.mxu2  ;;  %998 = vmatmul.bf16.gmra.mxu3 %v3116_v33 }
  0xfa   : > { %4615 = vst [vmem:[#allocation7_spill] sm:$0xff] %v3102_v10  ;;  %v3104_v11 = vpop.f32.mrf.mxu1 }
 0x101   : > { %v3108_v16 = vpop.f32.mrf.mxu2 }
 0x102   : > { %4616 = vst [vmem:[#allocation8_spill] sm:$0xff] %v3108_v16  ;;  %v3112_v18 = vpop.f32.mrf.mxu1 }
 0x103   : > { %4617 = vst [vmem:[#allocation9_spill] sm:$0xff] %v3112_v18 }
 0x105   : > { %770 = vmatmul.bf16.gmra.mxu1 %v3110_v17 }
 0x106   : > { %899 = vmatmul.bf16.gmra.mxu2 %v2944_v45 }
 0x109   : > { %v3121_v22 = vpop.f32.mrf.mxu2 }
 0x10a   : > { %4618 = vst [vmem:[#allocation10_spill] sm:$0xff] %v3121_v22  ;;  %v3123_v23 = vpop.f32.mrf.mxu1 }
 0x10b   : > { %4619 = vst [vmem:[#allocation11_spill] sm:$0xff] %v3123_v23 }
 0x111   : > { %v3127_v30 = vpop.f32.mrf.mxu2 }
 0x112   : > { %4620 = vst [vmem:[#allocation12_spill] sm:$0xff] %v3127_v30  ;;  %v3131_v36 = vpop.f32.mrf.mxu1 }
 0x113   : > { %4621 = vst [vmem:[#allocation13_spill] sm:$0xff] %v3131_v36  ;;  %v1158_v36 = vld [vmem:[%s4519_s3 + $0x30] sm:$0xff] }
 0x115   : > { %775 = vmatmul.bf16.gmra.mxu1 %v3129_v31 }
 0x116   : > { %904 = vmatmul.bf16.gmra.mxu2 %v2990_v7 }
 0x119   : > { %v3135_v37 = vpop.f32.mrf.mxu2 }
 0x11a   : > { %4622 = vst [vmem:[#allocation14_spill] sm:$0xff] %v3135_v37  ;;  %v3137_v45 = vpop.f32.mrf.mxu1 }
 0x11b   : > { %4623 = vst [vmem:[#allocation15_spill] sm:$0xff] %v3137_v45  ;;  %v1181_v45 = vld [vmem:[%s4519_s3 + $0xe8] sm:$0xff] }
 0x121   : > { %v3141_v46 = vpop.f32.mrf.mxu2 }
 0x122   : > { %4624 = vst [vmem:[#allocation16_spill] sm:$0xff] %v3141_v46  ;;  %v3145_v51 = vpop.f32.mrf.mxu1 }
 0x123   : > { %4625 = vst [vmem:[#allocation17_spill] sm:$0xff] %v3145_v51 }
 0x125   : > { %780 = vmatmul.bf16.gmra.mxu1 %v3143_v47 }
 0x126   : > { %909 = vmatmul.bf16.gmra.mxu2 %v3005_v20 }
 0x129   : > { %v3149_v3 = vpop.f32.mrf.mxu2 }
 0x12a   : > { %4626 = vst [vmem:[#allocation18_spill] sm:$0xff] %v3149_v3  ;;  %v3151_v56 = vpop.f32.mrf.mxu1 }
 0x12b   : > { %4627 = vst [vmem:[#allocation19_spill] sm:$0xff] %v3151_v56 }
 0x131   : > { %v3153_v7 = vpop.f32.mrf.mxu2 }
 0x132   : > { %4628 = vst [vmem:[#allocation20_spill] sm:$0xff] %v3153_v7  ;;  %v3155_v57 = vpop.f32.mrf.mxu1  ;;  %v1160_v7 = vld [vmem:[%s4519_s3 + $0x40] sm:$0xff] }
 0x135   : > { %785 = vmatmul.bf16.gmra.mxu1 %v2997_v15  ;;  %v1167_v15 = vld [vmem:[%s4519_s3 + $0x78] sm:$0xff] }
 0x136   : > { %923 = vmatmul.bf16.vlgmr.msrb.gmra.mxu2 %v3015_v28  ;;  %1216 = vmatpush.msra.mxu1 %v1167_v15  ;;  %v1164_v15 = vld [vmem:[%s4519_s3 + $0x60] sm:$0xff] }
 0x138   : > { %1217 = vmatpush.msra.mxu1 %v1166_v13 }
 0x139   : > { %v3159_v61 = vpop.f32.mrf.mxu2 }
 0x13a   : > { %4629 = vst [vmem:[#allocation21_spill] sm:$0xff] %v3159_v61  ;;  %v3161_v12 = vpop.f32.mrf.mxu1  ;;  %1218 = vmatpush.msra.mxu1 %v1165_v21 }
 0x13c   : > { %1219 = vmatpush.msra.mxu1 %v1164_v15  ;;  %v1163_v15 = vld [vmem:[%s4519_s3 + $0x58] sm:$0xff] }
 0x13e   : > { %1220 = vmatpush.msra.mxu1 %v1163_v15 }
 0x141   : > { %v3163_v1 = vpop.f32.mrf.mxu2 }
 0x142   : > { %4630 = vst [vmem:[#allocation22_spill] sm:$0xff] %v3163_v1  ;;  %v3165_v2 = vpop.f32.mrf.mxu1 }
 0x145   : > { %790 = vmatmul.bf16.gmra.mxu1 %v3009_v25 }
 0x146   : > { %928 = vmatmul.bf16.gmra.mxu2 %v3034_v39 }
 0x149   : > { %v3169_v20 = vpop.f32.mrf.mxu2 }
 0x14a   : > { %4631 = vst [vmem:[#allocation23_spill] sm:$0xff] %v3169_v20  ;;  %v3171_v8 = vpop.f32.mrf.mxu1 }
 0x151   : > { %v3176_v28 = vpop.f32.mrf.mxu2 }
 0x152   : > { %4632 = vst [vmem:[#allocation24_spill] sm:$0xff] %v3176_v28  ;;  %v3178_v24 = vpop.f32.mrf.mxu1 }
 0x155   : > { %795 = vmatmul.bf16.gmra.mxu1 %v3021_v32 }
 0x156   : > { %933 = vmatmul.bf16.gmra.mxu2 %v3053_v49 }
 0x159   : > { %v3182_v25 = vpop.f32.mrf.mxu2 }
 0x15a   : > { %4633 = vst [vmem:[#allocation25_spill] sm:$0xff] %v3182_v25  ;;  %v3184_v39 = vpop.f32.mrf.mxu1 }
 0x161   : > { %v3189_v14 = vpop.f32.mrf.mxu2 }
 0x162   : > { %4634 = vst [vmem:[#allocation26_spill] sm:$0xff] %v3189_v14  ;;  %v3191_v19 = vpop.f32.mrf.mxu1  ;;  %v1162_v14 = vld [vmem:[%s4519_s3 + $0x50] sm:$0xff] }
 0x163   : > { %1221 = vmatpush.msra.mxu1 %v1162_v14  ;;  %v1161_v14 = vld [vmem:[%s4519_s3 + $0x48] sm:$0xff] }
 0x165   : > { %800 = vmatmul.bf16.gmra.mxu1 %v3040_v42  ;;  %v3210_v42 = vpop.f32.mrf.mxu0 }
 0x166   : > { %938 = vmatmul.bf16.gmra.mxu2 %v3072_v59  ;;  %1222 = vmatpush.msra.mxu1 %v1161_v14  ;;  %v3343_v23 = vadd.f32 %v3161_v12, %v3210_v42 }
 0x168   : > { %1223 = vmatpush.msra.mxu1 %v1160_v7  ;;  %v1191_v7 = vld [vmem:[%s4519_s3 + $0x138] sm:$0xff]  ;;  %4651 = vst [vmem:[#allocation43_spill] sm:$0xff] %v3343_v23 }
 0x169   : > { %v3195_v32 = vpop.f32.mrf.mxu2  ;;  %1204 = vmatpush.msrb.mxu0 %v1191_v7 }
 0x16a   : > { %4635 = vst [vmem:[#allocation27_spill] sm:$0xff] %v3195_v32  ;;  %v3197_v49 = vpop.f32.mrf.mxu1 }
 0x16d   : > { %v3221_v21 = vpop.f32.mrf.mxu0 }
 0x171   : > { %v3204_v27 = vpop.f32.mrf.mxu2 }
 0x172   : > { %4636 = vst [vmem:[#allocation28_spill] sm:$0xff] %v3204_v27  ;;  %v3206_v41 = vpop.f32.mrf.mxu1 }
 0x175   : > { %805 = vmatmul.bf16.gmra.mxu1 %v3059_v52 }
 0x176   : > { %943 = vmatmul.bf16.gmra.mxu2 %v3091_v5 }
 0x179   : > { %v3212_v59 = vpop.f32.mrf.mxu2 }
 0x17a   : > { %4637 = vst [vmem:[#allocation29_spill] sm:$0xff] %v3212_v59  ;;  %v3214_v55 = vpop.f32.mrf.mxu1  ;;  %v3231_v59 = vpop.f32.mrf.mxu0 }
 0x17b   : > { %v3365_v42 = vadd.f32 %v3171_v8, %v3231_v59  ;;  %v1189_v8 = vld [vmem:[%s4519_s3 + $0x128] sm:$0xff] }
 0x17c   : > { %v1157_v59 = vld [vmem:[%s4519_s3 + $0x28] sm:$0xff] }
 0x181   : > { %v3219_v13 = vpop.f32.mrf.mxu2 }
 0x182   : > { %4638 = vst [vmem:[#allocation30_spill] sm:$0xff] %v3219_v13  ;;  %v3223_v27 = vpop.f32.mrf.mxu1 }
 0x185   : > { %810 = vmatmul.bf16.gmra.mxu1 %v3078_v62  ;;  %v3241_v62 = vpop.f32.mrf.mxu0 }
 0x186   : > { %948 = vmatmul.bf16.gmra.mxu2 %v3110_v17 }
 0x189   : > { %v3227_v52 = vpop.f32.mrf.mxu2 }
 0x18a   : > { %4639 = vst [vmem:[#allocation31_spill] sm:$0xff] %v3227_v52  ;;  %v3229_v5 = vpop.f32.mrf.mxu1 }
 0x18d   : > { %v3251_v15 = vpop.f32.mrf.mxu0 }
 0x191   : > { %v3236_v13 = vpop.f32.mrf.mxu2 }
 0x192   : > { %4640 = vst [vmem:[#allocation32_spill] sm:$0xff] %v3236_v13  ;;  %v3238_v32 = vpop.f32.mrf.mxu1 }
 0x195   : > { %815 = vmatmul.bf16.gmra.mxu1 %v3097_v9 }
 0x196   : > { %953 = vmatmul.bf16.gmra.mxu2 %v3129_v31  ;;  %v3261_v31 = vpop.f32.mrf.mxu0 }
 0x199   : > { %v3244_v17 = vpop.f32.mrf.mxu2 }
 0x19a   : > { %4641 = vst [vmem:[#allocation33_spill] sm:$0xff] %v3244_v17  ;;  %v3246_v52 = vpop.f32.mrf.mxu1 }
 0x19e   : > { %v3272_v20 = vpop.f32.mrf.mxu0 }
 0x1a1   : > { %v3253_v13 = vpop.f32.mrf.mxu2 }
 0x1a2   : > { %4642 = vst [vmem:[#allocation34_spill] sm:$0xff] %v3253_v13  ;;  %v3255_v25 = vpop.f32.mrf.mxu1 }
 0x1a5   : > { %820 = vmatmul.bf16.gmra.mxu1 %v3116_v33  ;;  %v3274_v33 = vpop.f32.mrf.mxu3 }
 0x1a6   : > { %958 = vmatmul.bf16.gmra.mxu2 %v3143_v47  ;;  %4645 = vst [vmem:[#allocation37_spill] sm:$0xff] %v3274_v33  ;;  %v3280_v1 = vpop.f32.mrf.mxu0  ;;  %v1183_v33 = vld [vmem:[%s4519_s3 + $0xf8] sm:$0xff] }
 0x1a7   : > { %1236 = vmatpush.msra.mxu2 %v1183_v33  ;;  %v1182_v33 = vld [vmem:[%s4519_s3 + $0xf0] sm:$0xff] }
 0x1a9   : > { %v3259_v9 = vpop.f32.mrf.mxu2  ;;  %1237 = vmatpush.msra.mxu2 %v1182_v33  ;;  %v1190_v33 = vld [vmem:[%s4519_s3 + $0x130] sm:$0xff] }
 0x1aa   : > { %4643 = vst [vmem:[#allocation35_spill] sm:$0xff] %v3259_v9  ;;  %v3263_v17 = vpop.f32.mrf.mxu1  ;;  %1205 = vmatpush.msrb.mxu0 %v1190_v33 }
 0x1ab   : > { %1238 = vmatpush.msra.mxu2 %v1181_v45  ;;  %v1180_v45 = vld [vmem:[%s4519_s3 + $0xe0] sm:$0xff] }
 0x1ac   : > { %1206 = vmatpush.msrb.mxu0 %v1189_v8 }
 0x1ad   : > { %v3285_v14 = vpop.f32.mrf.mxu3  ;;  %1239 = vmatpush.msra.mxu2 %v1180_v45 }
 0x1ae   : > { %4646 = vst [vmem:[#allocation38_spill] sm:$0xff] %v3285_v14  ;;  %v3294_v3 = vpop.f32.mrf.mxu0  ;;  %v1159_v14 = vld [vmem:[%s4519_s3 + $0x38] sm:$0xff] }
 0x1af   : > { %1224 = vmatpush.msra.mxu1 %v1159_v14 }
 0x1b1   : > { %v3268_v28 = vpop.f32.mrf.mxu2  ;;  %1225 = vmatpush.msra.mxu1 %v1158_v36  ;;  %v4524_v36 = vmax.f32 %v3343_v23, 0.0 }
 0x1b2   : > { %4644 = vst [vmem:[#allocation36_spill] sm:$0xff] %v3268_v28  ;;  %v3270_v13 = vpop.f32.mrf.mxu1 }
 0x1b3   : > { %1226 = vmatpush.msra.mxu1 %v1157_v59 }
 0x1b5   : > { %v3300_v37 = vpop.f32.mrf.mxu3 }
 0x1b6   : > { %4647 = vst [vmem:[#allocation39_spill] sm:$0xff] %v3300_v37  ;;  %v3313_v51 = vpop.f32.mrf.mxu0 }
 0x1b9   : > { %v3276_v47 = vpop.f32.mrf.mxu2 }
 0x1ba   : > { %v3278_v9 = vpop.f32.mrf.mxu1 }
 0x1bd   : > { %v3317_v22 = vpop.f32.mrf.mxu3 }
 0x1be   : > { %4648 = vst [vmem:[#allocation40_spill] sm:$0xff] %v3317_v22  ;;  %v684_v16 = vpop.f32.mrf.mxu0  ;;  %v3339_v22 = vadd.f32 %v3155_v57, %v3202_v26  ;;  %v1179_v57 = vld [vmem:[%s4519_s3 + $0xd8] sm:$0xff] }
 0x1bf   : > { %1240 = vmatpush.msra.mxu2 %v1179_v57 }
 0x1c0   : > { %4650 = vst [vmem:[#allocation42_spill] sm:$0xff] %v3339_v22  ;;  %v4526_v33 = vmax.f32 %v3339_v22, 0.0  ;;  %v4529_v22 = vmax.f32 %v3365_v42, 0.0 }
 0x1c1   : > { %v3287_v28 = vpop.f32.mrf.mxu2 }
 0x1c2   : > { %v3289_v61 = vpop.f32.mrf.mxu1  ;;  %v1069_v12 = vadd.f32 %v4524_v36, %v4526_v33  ;;  %v3378_v36 = vadd.f32 %v3178_v24, %v3241_v62  ;;  %v3394_v33 = vadd.f32 %v3184_v39, %v3251_v15  ;;  %v1177_v39 = vld [vmem:[%s4519_s3 + $0xc8] sm:$0xff] }
 0x1c4   : > { %4653 = vst [vmem:[#allocation45_spill] sm:$0xff] %v3378_v36  ;;  %v4530_v62 = vmax.f32 %v3378_v36, 0.0 }
 0x1c5   : > { %v3332_v10 = vpop.f32.mrf.mxu3 }
 0x1c6   : > { %4649 = vst [vmem:[#allocation41_spill] sm:$0xff] %v3332_v10  ;;  %v3353_v10 = vadd.f32 %v3165_v2, %v3221_v21  ;;  %v687_v45 = vpop.f32.mrf.mxu0 }
 0x1c8   : > { %4652 = vst [vmem:[#allocation44_spill] sm:$0xff] %v3353_v10  ;;  %v4525_v26 = vmax.f32 %v3353_v10, 0.0 }
 0x1c9   : > { %v3296_v56 = vpop.f32.mrf.mxu2 }
 0x1ca   : > { %v3298_v46 = vpop.f32.mrf.mxu1  ;;  %v1070_v57 = vadd.f32 %v1069_v12, %v4525_v26  ;;  %v1178_v12 = vld [vmem:[%s4519_s3 + $0xd0] sm:$0xff] }
 0x1cb   : > { %1241 = vmatpush.msra.mxu2 %v1178_v12  ;;  %v4532_v12 = vmax.f32 %v3394_v33, 0.0 }
 0x1cc   : > { %v1071_v24 = vadd.f32 %v1070_v57, %v4529_v22  ;;  %v3407_v57 = vadd.f32 %v3191_v19, %v3261_v31  ;;  %v3411_v22 = vadd.f32 %v3197_v49, %v3272_v20  ;;  %v3430_v49 = vadd.f32 %v3214_v55, %v3294_v3  ;;  %v1156_v3 = vld [vmem:[%s4519_s3 + $0x20] sm:$0xff] }
 0x1cd   : > { %v3367_v63 = vpop.f32.mrf.mxu3  ;;  %1242 = vmatpush.msra.mxu2 %v1177_v39  ;;  %1227 = vmatpush.msra.mxu1 %v1156_v3 }
 0x1ce   : > { %v689_v26 = vpop.f32.mrf.mxu0  ;;  %v1072_v59 = vadd.f32 %v1071_v24, %v4530_v62  ;;  %4654 = vst [vmem:[#allocation46_spill] sm:$0xff] %v3407_v57  ;;  %v4533_v24 = vmax.f32 %v3407_v57, 0.0  ;;  %v3421_v62 = vadd.f32 %v3206_v41, %v3280_v1  ;;  %v4536_v20 = vmax.f32 %v3411_v22, 0.0  ;;  %v1188_v41 = vld [vmem:[%s4519_s3 + $0x120] sm:$0xff] }
 0x1cf   : > { %4655 = vst [vmem:[#allocation47_spill] sm:$0xff] %v3411_v22  ;;  %v3439_v1 = vadd.f32 %v3223_v27, %v3313_v51  ;;  %1207 = vmatpush.msrb.mxu0 %v1188_v41  ;;  %v1176_v51 = vld [vmem:[%s4519_s3 + $0xc0] sm:$0xff]  ;;  %v3460_v22 = vadd.f32 %v3238_v32, %v687_v45  ;;  %v3470_v41 = vadd.f32 %v3246_v52, %v689_v26  ;;  %v1175_v52 = vld [vmem:[%s4519_s3 + $0xb8] sm:$0xff] }
 0x1d0   : > { %v1073_v15 = vadd.f32 %v1072_v59, %v4532_v12  ;;  %v4537_v12 = vmax.f32 %v3421_v62, 0.0  ;;  %1243 = vmatpush.msra.mxu2 %v1176_v51 }
 0x1d1   : > { %v3311_v30 = vpop.f32.mrf.mxu2  ;;  %v4551_v57 = vmax.f32 %v3439_v1, 0.0  ;;  %v4539_v51 = vmax.f32 %v3460_v22, 0.0 }
 0x1d2   : > { %v3315_v37 = vpop.f32.mrf.mxu1  ;;  %v1074_v59 = vadd.f32 %v1073_v15, %v4533_v24  ;;  %v4538_v15 = vmax.f32 %v3430_v49, 0.0  ;;  %v3451_v24 = vadd.f32 %v3229_v5, %v684_v16  ;;  %1244 = vmatpush.msra.mxu2 %v1175_v52  ;;  %v3505_v52 = vadd.f32 %v3278_v9, %v3028_v35 }
 0x1d4   : > { %v1075_v55 = vadd.f32 %v1074_v59, %v4536_v20  ;;  %v4550_v5 = vmax.f32 %v3451_v24, 0.0  ;;  %v4546_v9 = vmax.f32 %v3505_v52, 0.0 }
 0x1d5   : > { %v3400_v8 = vpop.f32.mrf.mxu3 }
 0x1d6   : > { %v692_v31 = vpop.f32.mrf.mxu0  ;;  %v1076_v27 = vadd.f32 %v1075_v55, %v4537_v12 }
 0x1d7   : > { %v3476_v32 = vadd.f32 %v3255_v25, %v692_v31  ;;  %v3494_v31 = vadd.f32 %v3270_v13, %v3017_v29  ;;  %v3512_v29 = vadd.f32 %v3289_v61, %v3036_v40  ;;  %v1187_v13 = vld [vmem:[%s4519_s3 + $0x118] sm:$0xff] }
 0x1d8   : > { %v1077_v16 = vadd.f32 %v1076_v27, %v4538_v15  ;;  %v4541_v27 = vmax.f32 %v3470_v41, 0.0  ;;  %1208 = vmatpush.msrb.mxu0 %v1187_v13 }
 0x1d9   : > { %v3322_v7 = vpop.f32.mrf.mxu2  ;;  %v4540_v25 = vmax.f32 %v3476_v32, 0.0 }
 0x1da   : > { %v3324_v14 = vpop.f32.mrf.mxu1  ;;  %v1078_v55 = vadd.f32 %v1077_v16, %v4551_v57 }
 0x1dc   : > { %v1079_v12 = vadd.f32 %v1078_v55, %v4550_v5  ;;  %v4666_v5 = vld [vmem:[#allocation7_spill] sm:$0xff] }
 0x1dd   : > { %v3434_v39 = vpop.f32.mrf.mxu3 }
 0x1de   : > { %v694_v3 = vpop.f32.mrf.mxu0  ;;  %v1080_v26 = vadd.f32 %v1079_v12, %v4539_v51  ;;  %v4548_v51 = vmax.f32 %v3494_v31, 0.0 }
 0x1df   : > { %v3484_v15 = vadd.f32 %v3263_v17, %v694_v3 }
 0x1e0   : > { %v1081_v17 = vadd.f32 %v1080_v26, %v4541_v27  ;;  %v1155_v26 = vld [vmem:[%s4519_s3 + $0x18] sm:$0xff]  ;;  %v3534_v27 = vadd.f32 %v3315_v37, %v3055_v50  ;;  %v3553_v50 = vadd.f32 %v3276_v47, %v3026_v34  ;;  %v3557_v37 = vadd.f32 %v3296_v56, %v3045_v43 }
 0x1e1   : > { %v3345_v4 = vpop.f32.mrf.mxu2  ;;  %v4542_v3 = vmax.f32 %v3484_v15, 0.0  ;;  %1228 = vmatpush.msra.mxu1 %v1155_v26  ;;  %v3549_v26 = vadd.f32 %v3324_v14, %v3066_v54  ;;  %v3569_v14 = vadd.f32 %v3311_v30, %v3051_v48 }
 0x1e2   : > { %v3347_v18 = vpop.f32.mrf.mxu1  ;;  %v1082_v12 = vadd.f32 %v1081_v17, %v4540_v25  ;;  %v3525_v17 = vadd.f32 %v3298_v46, %v3047_v44  ;;  %v4545_v25 = vmax.f32 %v3512_v29, 0.0  ;;  %v4564_v47 = vmax.f32 %v3553_v50, 0.0 }
 0x1e3   : > { %v4547_v43 = vmax.f32 %v3549_v26, 0.0 }
 0x1e4   : > { %v1083_v35 = vadd.f32 %v1082_v12, %v4542_v3  ;;  %v3540_v3 = vadd.f32 %v3287_v28, %v3032_v38  ;;  %v4544_v13 = vmax.f32 %v3525_v17, 0.0  ;;  %v4543_v28 = vmax.f32 %v3534_v27, 0.0 }
 0x1e5   : > { %v3478_v45 = vpop.f32.mrf.mxu3 }
 0x1e6   : > { %v1084_v61 = vadd.f32 %v1083_v35, %v4548_v51  ;;  %v3564_v35 = vadd.f32 %v3347_v18, %v3074_v60  ;;  %v4563_v54 = vmax.f32 %v3540_v3, 0.0  ;;  %v4558_v60 = vmax.f32 %v3557_v37, 0.0  ;;  %v4663_v51 = vld [vmem:[#allocation6_spill] sm:$0xff] }
 0x1e7   : > { %v3582_v18 = vadd.f32 %v3322_v7, %v3064_v53  ;;  %v3600_v53 = vadd.f32 %v3345_v4, %v3070_v58 }
 0x1e8   : > { %v1085_v46 = vadd.f32 %v1084_v61, %v4546_v9  ;;  %4656 = vst [vmem:[#allocation48_spill] sm:$0xff] %v3564_v35  ;;  %v4549_v30 = vmax.f32 %v3564_v35, 0.0 }
 0x1e9   : > { %v3369_v2 = vpop.f32.mrf.mxu2 }
 0x1ea   : > { %v3371_v21 = vpop.f32.mrf.mxu1  ;;  %v1086_v38 = vadd.f32 %v1085_v46, %v4545_v25  ;;  %v4660_v25 = vld [vmem:[#allocation5_spill] sm:$0xff] }
 0x1eb   : > { %v3576_v56 = vadd.f32 %v3371_v21, %v3085_v0  ;;  %v1106_v0 = vadd.f32 %v4563_v54, %v4564_v47  ;;  %v4556_v21 = vmax.f32 %v3569_v14, 0.0  ;;  %v3622_v9 = vadd.f32 %v3369_v2, %v4660_v25  ;;  %v4661_v2 = vld [vmem:[#allocation9_spill] sm:$0xff]  ;;  %v4677_v54 = vld [vmem:[#allocation16_spill] sm:$0xff] }
 0x1ec   : > { %v1087_v34 = vadd.f32 %v1086_v38, %v4544_v13  ;;  %v4553_v13 = vmax.f32 %v3582_v18, 0.0 }
 0x1ed   : > { %v3527_v40 = vpop.f32.mrf.mxu3  ;;  %4657 = vst [vmem:[#allocation49_spill] sm:$0xff] %v3576_v56  ;;  %v1107_v4 = vadd.f32 %v1106_v0, %v4558_v60 }
 0x1ee   : > { %v1088_v48 = vadd.f32 %v1087_v34, %v4543_v28  ;;  %v4552_v28 = vmax.f32 %v3576_v56, 0.0 }
 0x1f0   : > { %v1089_v34 = vadd.f32 %v1088_v48, %v4547_v43  ;;  %v1185_v48 = vld [vmem:[%s4519_s3 + $0x108] sm:$0xff]  ;;  %v4555_v43 = vmax.f32 %v3600_v53, 0.0 }
 0x1f1   : > { %v3396_v10 = vpop.f32.mrf.mxu2 }
 0x1f2   : > { %v3398_v23 = vpop.f32.mrf.mxu1 }
 0x1f3   : > { %v3589_v61 = vadd.f32 %v3398_v23, %v3093_v6  ;;  %v1186_v6 = vld [vmem:[%s4519_s3 + $0x110] sm:$0xff] }
 0x1f4   : > { %v1154_v23 = vld [vmem:[%s4519_s3 + $0x10] sm:$0xff]  ;;  %1209 = vmatpush.msrb.mxu0 %v1186_v6 }
 0x1f5   : > { %4658 = vst [vmem:[#allocation50_spill] sm:$0xff] %v3589_v61  ;;  %v3608_v38 = vpop.f32.mrf.mxu3  ;;  %1229 = vmatpush.msra.mxu1 %v1154_v23  ;;  %v4554_v0 = vmax.f32 %v3589_v61, 0.0  ;;  %v1174_v6 = vld [vmem:[%s4519_s3 + $0xb0] sm:$0xff]  ;;  %v1108_v23 = vadd.f32 %v1107_v4, %v4556_v21  ;;  %v4699_v61 = vld [vmem:[#allocation41_spill] sm:$0xff] }
 0x1f6   : > { %1210 = vmatpush.msrb.mxu0 %v1185_v48  ;;  %1245 = vmatpush.msra.mxu2 %v1174_v6  ;;  %v4559_v6 = vmax.f32 %v3622_v9, 0.0 }
 0x1f9   : > { %v3423_v19 = vpop.f32.mrf.mxu2 }
 0x1fa   : > { %v3425_v36 = vpop.f32.mrf.mxu1  ;;  %v3672_v57 = vadd.f32 %v3423_v19, %v4666_v5  ;;  %v4669_v5 = vld [vmem:[#allocation8_spill] sm:$0xff] }
 0x1fb   : > { %v3615_v58 = vadd.f32 %v3425_v36, %v3104_v11  ;;  %v1153_v11 = vld [vmem:[%s4519_s3 + $0x8] sm:$0xff]  ;;  %v1090_v36 = vadd.f32 %v1089_v34, %v4549_v30  ;;  %v3651_v34 = vadd.f32 %v3396_v10, %v4663_v51  ;;  %v1068_v10 = vld [vmem:[%s3634_s10] sm:$0x1]  ;;  %v1109_v51 = vadd.f32 %v1108_v23, %v4553_v13 }
 0x1fc   : > { %1230 = vmatpush.msra.mxu1 %v1153_v11  ;;  %v4664_v11 = vld [vmem:[#allocation11_spill] sm:$0xff] }
 0x1fd   : > { %4659 = vst [vmem:[#allocation51_spill] sm:$0xff] %v3615_v58  ;;  %v1091_v48 = vadd.f32 %v1090_v36, %v4552_v28  ;;  %v4557_v4 = vmax.f32 %v3615_v58, 0.0  ;;  %v2658_v28 = vmov 256.0   ;;  %v1110_v23 = vadd.f32 %v1109_v51, %v4555_v43  ;;  %v4672_v43 = vld [vmem:[#allocation10_spill] sm:$0xff] }
 0x1fe   : > { %2579 = vrcp.f32 %v2658_v28  ;;  %v4561_v19 = vmax.f32 %v3651_v34, 0.0  ;;  %v4565_v51 = vmax.f32 %v3672_v57, 0.0 }
 0x1ff   : > { %v1092_v36 = vadd.f32 %v1091_v48, %v4554_v0  ;;  %v1111_v28 = vadd.f32 %v1110_v23, %v4559_v6 }
 0x201   : > { %v3462_v59 = vpop.f32.mrf.mxu2  ;;  %v1093_v48 = vadd.f32 %v1092_v36, %v4557_v4  ;;  %v4673_v4 = vld [vmem:[#allocation17_spill] sm:$0xff] }
 0x202   : > { %v3464_v20 = vpop.f32.mrf.mxu1 }
 0x203   : > { %v3641_v25 = vadd.f32 %v3464_v20, %v4661_v2  ;;  %v1184_v20 = vld [vmem:[%s4519_s3 + $0x100] sm:$0xff] }
 0x204   : > { %v1152_v2 = vld [vmem:[%s4519_s3] sm:$0xff]  ;;  %1211 = vmatpush.msrb.mxu0 %v1184_v20 }
 0x205   : > { %4662 = vst [vmem:[#allocation5_spill] sm:$0xff] %v3641_v25  ;;  %1231 = vmatpush.msra.mxu1 %v1152_v2  ;;  %2434 = vmatmul.msk.f32.vlgmr.msrb.gmra.mxu0 %vm1192_vm0, %v1068_v10  ;;  %v4667_v20 = vld [vmem:[#allocation13_spill] sm:$0xff]  ;;  %v3687_v10 = vadd.f32 %v3462_v59, %v4669_v5  ;;  %v3702_v59 = vpop.f32.mrf.mxu3 }
 0x207   : > { %v4567_v23 = vmax.f32 %v3687_v10, 0.0 }
 0x209   : > { %v3496_v16 = vpop.f32.mrf.mxu2 }
 0x20a   : > { %v3498_v55 = vpop.f32.mrf.mxu1  ;;  %v3700_v21 = vadd.f32 %v3496_v16, %v4672_v43  ;;  %v3717_v16 = vpop.eup %2579 }
 0x20b   : > { %v3664_v30 = vadd.f32 %v3498_v55, %v4664_v11  ;;  %v4560_v55 = vmax.f32 %v3641_v25, 0.0  ;;  %vm1148_vm1 = vweird.f32 %v3717_v16 }
 0x20d   : > { %4665 = vst [vmem:[#allocation9_spill] sm:$0xff] %v3664_v30  ;;  %v4562_v0 = vmax.f32 %v3664_v30, 0.0  ;;  %v1094_v5 = vadd.f32 %v1093_v48, %v4560_v55  ;;  %v4676_v55 = vld [vmem:[#allocation14_spill] sm:$0xff] }
 0x20f   : > { %v1095_v43 = vadd.f32 %v1094_v5, %v4562_v0 }
 0x211   : > { %v3536_v12 = vpop.f32.mrf.mxu2 }
 0x212   : > { %v3542_v44 = vpop.f32.mrf.mxu1 }
 0x213   : > { %v3680_v2 = vadd.f32 %v3542_v44, %v4667_v20  ;;  %v4670_v44 = vld [vmem:[#allocation15_spill] sm:$0xff] }
 0x215   : > { %4668 = vst [vmem:[#allocation6_spill] sm:$0xff] %v3680_v2  ;;  %v4566_v36 = vmax.f32 %v3680_v2, 0.0 }
 0x219   : > { %v3591_v46 = vpop.f32.mrf.mxu2 }
 0x21a   : > { %v818_v7 = vpop.f32.mrf.mxu1 }
 0x21b   : > { %v3693_v20 = vadd.f32 %v818_v7, %v4670_v44  ;;  %v1112_v7 = vadd.f32 %v1111_v28, %v4561_v19  ;;  %v4675_v44 = vld [vmem:[#allocation12_spill] sm:$0xff]  ;;  %v3727_v28 = vadd.f32 %v3591_v46, %v4676_v55  ;;  %v4678_v55 = vld [vmem:[#allocation19_spill] sm:$0xff] }
 0x21c   : > { %v3715_v6 = vadd.f32 %v3536_v12, %v4675_v44  ;;  %v1096_v12 = vadd.f32 %v1095_v43, %v4566_v36  ;;  %v4680_v43 = vmax.f32 %v3700_v21, 0.0 }
 0x21d   : > { %4671 = vst [vmem:[#allocation11_spill] sm:$0xff] %v3693_v20  ;;  %v4570_v48 = vmax.f32 %v3693_v20, 0.0  ;;  %v4573_v44 = vmax.f32 %v3727_v28, 0.0 }
 0x21e   : > { %v4683_v2 = vmax.f32 %v3715_v6, 0.0 }
 0x21f   : > { %v1097_v46 = vadd.f32 %v1096_v12, %v4570_v48  ;;  %v4685_v48 = vld [vmem:[#allocation37_spill] sm:$0xff] }
 0x221   : > { %v956_v11 = vpop.f32.mrf.mxu2 }
 0x222   : > { %v821_v13 = vpop.f32.mrf.mxu1  ;;  %v3736_v47 = vadd.f32 %v956_v11, %v4677_v54 }
 0x223   : > { %v3708_v60 = vadd.f32 %v821_v13, %v4673_v4  ;;  %v1113_v13 = vadd.f32 %v1112_v7, %v4565_v51  ;;  %v1144_v51 = vmul.f32 256.0, %v3717_v16 }
 0x225   : > { %4674 = vst [vmem:[#allocation7_spill] sm:$0xff] %v3708_v60  ;;  %v1114_v5 = vadd.f32 %v1113_v13, %v4567_v23  ;;  %v4681_v13 = vld [vmem:[#allocation18_spill] sm:$0xff]  ;;  %v4682_v54 = vmax.f32 %v3708_v60, 0.0 }
 0x226   : > { %v4688_v60 = vld [vmem:[#allocation22_spill] sm:$0xff] }
 0x227   : > { %v1115_v36 = vadd.f32 %v1114_v5, %v4680_v43  ;;  %v1098_v11 = vadd.f32 %v1097_v46, %v4682_v54  ;;  %v1173_v5 = vld [vmem:[%s4519_s3 + $0xa8] sm:$0xff]  ;;  %v4684_v54 = vld [vmem:[#allocation21_spill] sm:$0xff] }
 0x228   : > { %1246 = vmatpush.msra.mxu2 %v1173_v5  ;;  %v3774_v12 = vadd.f32 %v4685_v48, %v4684_v54 }
 0x229   : > { %v959_v19 = vpop.f32.mrf.mxu2  ;;  %v1116_v20 = vadd.f32 %v1115_v36, %v4683_v2 }
 0x22a   : > { %v823_v7 = vpop.f32.mrf.mxu1  ;;  %v3748_v23 = vadd.f32 %v959_v19, %v4681_v13  ;;  %v1172_v19 = vld [vmem:[%s4519_s3 + $0xa0] sm:$0xff] }
 0x22b   : > { %v3742_v4 = vadd.f32 %v823_v7, %v4678_v55  ;;  %v1145_v7 = vsub.f32 1.0, %v1144_v51  ;;  %v3762_v55 = vpop.f32.mrf.mxu3  ;;  %v1117_v2 = vadd.f32 %v1116_v20, %v4573_v44  ;;  %v1171_v51 = vld [vmem:[%s4519_s3 + $0x98] sm:$0xff]  ;;  %1247 = vmatpush.msra.mxu2 %v1172_v19  ;;  %v1170_v44 = vld [vmem:[%s4519_s3 + $0x90] sm:$0xff]  ;;  %v4689_v19 = vld [vmem:[#allocation38_spill] sm:$0xff] }
 0x22c   : > { %v3787_v30 = vadd.f32 %v4689_v19, %v4688_v60  ;;  %v4690_v48 = vmax.f32 %v3748_v23, 0.0 }
 0x22d   : > { %4679 = vst [vmem:[#allocation13_spill] sm:$0xff] %v3742_v4  ;;  %v4572_v0 = vmax.f32 %v3742_v4, 0.0  ;;  %v4686_v4 = vmax.f32 %v3736_v47, 0.0  ;;  %v1146_v5 = vmul.f32 %v3717_v16, %v1145_v7  ;;  %1248 = vmatpush.msra.mxu2 %v1171_v51 }
 0x22f   : > { %v1099_v46 = vadd.f32 %v1098_v11, %v4572_v0  ;;  %v1118_v11 = vadd.f32 %v1117_v2, %v4686_v4  ;;  %v4687_v0 = vld [vmem:[#allocation20_spill] sm:$0xff]  ;;  %1249 = vmatpush.msra.mxu2 %v1170_v44  ;;  %v1147_v60 = vadd.f32 %v3717_v16, %v1146_v5  ;;  %v4592_v44 = vmax.f32 %v3787_v30, 0.0 }
 0x230   : > { %v4695_v2 = vld [vmem:[#allocation40_spill] sm:$0xff] }
 0x231   : > { %v1100_v43 = vrot.slane %v1099_v46, 4  ;;  %v961_v13 = vpop.f32.mrf.mxu2  ;;  %v1119_v54 = vadd.f32 %v1118_v11, %v4690_v48  ;;  %v1168_v11 = vld [vmem:[%s4519_s3 + $0x80] sm:$0xff]  ;;  %v4694_v48 = vld [vmem:[#allocation24_spill] sm:$0xff] }
 0x232   : > { %v3780_v20 = vadd.f32 %v961_v13, %v4687_v0  ;;  %v1169_v0 = vld [vmem:[%s4519_s3 + $0x88] sm:$0xff]  ;;  %v4691_v13 = vld [vmem:[#allocation23_spill] sm:$0xff]  ;;  %v3810_v25 = vadd.f32 %v4695_v2, %v4694_v48 }
 0x233   : > { %v1101_v36 = vadd.f32 %v1100_v43, %v1099_v46  ;;  %v4692_v46 = vld [vmem:[#allocation39_spill] sm:$0xff]  ;;  %1250 = vmatpush.msra.mxu2 %v1169_v0  ;;  %v1149_v0 = vsel %vm1148_vm1, %v3717_v16, %v1147_v60  ;;  %v4701_v48 = vld [vmem:[#allocation26_spill] sm:$0xff]  ;;  %v4705_v60 = vld [vmem:[#allocation28_spill] sm:$0xff] }
 0x234   : > { %v4578_v4 = vmax.f32 %v3780_v20, 0.0  ;;  %v3798_v51 = vadd.f32 %v4692_v46, %v4691_v13  ;;  %4696 = vst [vmem:[#allocation15_spill] sm:$0xff] %v3810_v25  ;;  %v4697_v13 = vmax.f32 %v3774_v12, 0.0  ;;  %v996_v46 = vpop.f32.mrf.mxu3  ;;  %v4586_v2 = vmax.f32 %v3810_v25, 0.0 }
 0x235   : > { %v1102_v7 = vrot.slane %v1101_v36, 2  ;;  %1251 = vmatpush.msra.mxu2 %v1168_v11 }
 0x236   : > { %4693 = vst [vmem:[#allocation8_spill] sm:$0xff] %v3798_v51  ;;  %v1120_v43 = vadd.f32 %v1119_v54, %v4578_v4  ;;  %v4591_v54 = vmax.f32 %v3798_v51, 0.0  ;;  %v4698_v4 = vld [vmem:[#allocation25_spill] sm:$0xff] }
 0x237   : > { %v1103_v19 = vadd.f32 %v1102_v7, %v1101_v36  ;;  %v3817_v36 = vadd.f32 %v4699_v61, %v4698_v4  ;;  %v4703_v61 = vld [vmem:[#allocation27_spill] sm:$0xff] }
 0x238   : > { %v1121_v5 = vadd.f32 %v1120_v43, %v4697_v13  ;;  %v3825_v43 = vadd.f32 %v3367_v63, %v4701_v48  ;;  %v3832_v4 = vadd.f32 %v3400_v8, %v4703_v61  ;;  %v3839_v63 = vadd.f32 %v3434_v39, %v4705_v60  ;;  %v4711_v60 = vld [vmem:[#allocation31_spill] sm:$0xff] }
 0x239   : > { %v1104_v58 = vrot.slane %v1103_v19, 1  ;;  %4700 = vst [vmem:[#allocation10_spill] sm:$0xff] %v3817_v36  ;;  %v4582_v35 = vmax.f32 %v3817_v36, 0.0 }
 0x23a   : > { %v1122_v7 = vadd.f32 %v1121_v5, %v4592_v44  ;;  %4702 = vst [vmem:[#allocation17_spill] sm:$0xff] %v3825_v43  ;;  %v4707_v5 = vld [vmem:[#allocation29_spill] sm:$0xff] }
 0x23b   : > { %v1105_v56 = vadd.f32 %v1104_v58, %v1103_v19  ;;  %4704 = vst [vmem:[#allocation12_spill] sm:$0xff] %v3832_v4  ;;  %v4585_v58 = vmax.f32 %v3825_v43, 0.0 }
 0x23c   : > { %v1123_v11 = vadd.f32 %v1122_v7, %v4591_v54  ;;  %4706 = vst [vmem:[#allocation14_spill] sm:$0xff] %v3839_v63  ;;  %v3846_v7 = vadd.f32 %v3478_v45, %v4707_v5  ;;  %v999_v48 = vpop.f32.mrf.mxu3 }
 0x23d   : > { %v1150_v13 = vmul.f32 %v1149_v0, %v1105_v56  ;;  %v4584_v56 = vmax.f32 %v3832_v4, 0.0 }
 0x23e   : > { %v1124_v16 = vadd.f32 %v1123_v11, %v4586_v2  ;;  %4708 = vst [vmem:[#allocation16_spill] sm:$0xff] %v3846_v7  ;;  %v4583_v11 = vmax.f32 %v3839_v63, 0.0 }
 0x23f   : > { %1232 = vmatmul.f32.vlgmr.msra.gmra.mxu1 %v1150_v13  ;;  %v4709_v13 = vld [vmem:[#allocation30_spill] sm:$0xff] }
 0x240   : > { %v1125_v19 = vadd.f32 %v1124_v16, %v4582_v35  ;;  %v3853_v61 = vadd.f32 %v3527_v40, %v4709_v13  ;;  %v4587_v16 = vmax.f32 %v3846_v7, 0.0  ;;  %v3860_v35 = vadd.f32 %v3608_v38, %v4711_v60  ;;  %v1260_v40 = vld [vmem:[%s4520_s4 + $0x18] sm:$0xff]  ;;  %v4715_v60 = vld [vmem:[#allocation33_spill] sm:$0xff] }
 0x242   : > { %v1126_v8 = vadd.f32 %v1125_v19, %v4585_v58  ;;  %4710 = vst [vmem:[#allocation19_spill] sm:$0xff] %v3853_v61  ;;  %v1263_v19 = vld [vmem:[%s4520_s4 + $0x30] sm:$0xf]  ;;  %v4588_v5 = vmax.f32 %v3853_v61, 0.0  ;;  %v4717_v58 = vld [vmem:[#allocation34_spill] sm:$0xff] }
 0x243   : > { %4712 = vst [vmem:[#allocation18_spill] sm:$0xff] %v3860_v35  ;;  %2435 = vmatpush.msk.msrb.mxu3 %vm1270_vm2, %v1263_v19  ;;  %v3887_v2 = vadd.f32 %v996_v46, %v4717_v58 }
 0x244   : > { %v1127_v39 = vadd.f32 %v1126_v8, %v4584_v56  ;;  %v4713_v8 = vld [vmem:[#allocation32_spill] sm:$0xff] }
 0x245   : > { %v3874_v38 = vadd.f32 %v3702_v59, %v4713_v8  ;;  %1294 = vmatpush.msrb.mxu3 %v1260_v40  ;;  %4718 = vst [vmem:[#allocation20_spill] sm:$0xff] %v3887_v2  ;;  %v1001_v8 = vpop.f32.mrf.mxu3  ;;  %v4719_v40 = vld [vmem:[#allocation35_spill] sm:$0xff] }
 0x246   : > { %v1128_v45 = vadd.f32 %v1127_v39, %v4583_v11  ;;  %v4589_v39 = vmax.f32 %v3860_v35, 0.0  ;;  %v3881_v11 = vadd.f32 %v3762_v55, %v4715_v60  ;;  %v4595_v60 = vmax.f32 %v3887_v2, 0.0 }
 0x247   : > { %4714 = vst [vmem:[#allocation21_spill] sm:$0xff] %v3874_v38  ;;  %v4590_v19 = vmax.f32 %v3874_v38, 0.0 }
 0x248   : > { %v1129_v13 = vadd.f32 %v1128_v45, %v4587_v16  ;;  %4716 = vst [vmem:[#allocation37_spill] sm:$0xff] %v3881_v11  ;;  %v4596_v45 = vmax.f32 %v3881_v11, 0.0  ;;  %v3893_v16 = vadd.f32 %v999_v48, %v4719_v40 }
 0x24a   : > { %v1130_v56 = vadd.f32 %v1129_v13, %v4588_v5  ;;  %4720 = vst [vmem:[#allocation22_spill] sm:$0xff] %v3893_v16  ;;  %v4721_v13 = vld [vmem:[#allocation36_spill] sm:$0xff]  ;;  %v4594_v58 = vmax.f32 %v3893_v16, 0.0 }
 0x24b   : > { %v3899_v5 = vadd.f32 %v1001_v8, %v4721_v13 }
 0x24c   : > { %v1131_v59 = vadd.f32 %v1130_v56, %v4589_v39 }
 0x24d   : > { %4722 = vst [vmem:[#allocation38_spill] sm:$0xff] %v3899_v5  ;;  %v4593_v39 = vmax.f32 %v3899_v5, 0.0 }
 0x24e   : > { %v1132_v55 = vadd.f32 %v1131_v59, %v4590_v19 }
 0x250   : > { %v1133_v46 = vadd.f32 %v1132_v55, %v4596_v45 }
 0x252   : > { %v1134_v56 = vadd.f32 %v1133_v46, %v4595_v60  ;;  %v1257_v46 = vld [vmem:[%s4520_s4] sm:$0xff] }
 0x253   : > { %1295 = vmatpush.msrb.mxu3 %v1257_v46 }
 0x254   : > { %v1135_v48 = vadd.f32 %v1134_v56, %v4594_v58  ;;  %v1264_v56 = vld [vmem:[%s4520_s4 + $0x38] sm:$0xf] }
 0x255   : > { %2437 = vmatpush.msk.msrb.mxu1 %vm1270_vm2, %v1264_v56 }
 0x256   : > { %v1136_v59 = vadd.f32 %v1135_v48, %v4593_v39  ;;  %v1261_v48 = vld [vmem:[%s4520_s4 + $0x20] sm:$0xff] }
 0x257   : > { %1314 = vmatpush.msrb.mxu1 %v1261_v48 }
 0x258   : > { %v1137_v40 = vrot.slane %v1136_v59, 4 }
 0x25a   : > { %v1138_v19 = vadd.f32 %v1137_v40, %v1136_v59 }
 0x25c   : > { %v1139_v8 = vrot.slane %v1138_v19, 2 }
 0x25e   : > { %v1140_v13 = vadd.f32 %v1139_v8, %v1138_v19  ;;  %v1259_v19 = vld [vmem:[%s4520_s4 + $0x10] sm:$0xff] }
 0x260   : > { %v1141_v54 = vrot.slane %v1140_v13, 1 }
 0x262   : > { %v1142_v44 = vadd.f32 %v1141_v54, %v1140_v13  ;;  %v1265_v54 = vld [vmem:[%s4520_s4 + $0x40] sm:$0xf] }
 0x264   : > { %v1151_v55 = vmul.f32 %v1149_v0, %v1142_v44  ;;  %v1258_v44 = vld [vmem:[%s4520_s4 + $0x8] sm:$0xff] }
 0x265   : > { %1315 = vmatpush.msrb.mxu1 %v1258_v44  ;;  %v1262_v0 = vld [vmem:[%s4520_s4 + $0x28] sm:$0xff] }
 0x266   : > { %1252 = vmatmul.f32.vlgmr.msra.gmra.mxu2 %v1151_v55 }
 0x267   : > { %2439 = vmatpush.msk.msra.mxu1 %vm1270_vm2, %v1265_v54 }
 0x269   : > { %1334 = vmatpush.msra.mxu1 %v1262_v0 }
 0x26b   : > { %1335 = vmatpush.msra.mxu1 %v1259_v19 }
 0x282   : > { %v1213_v59 = vpop.f32.mrf.mxu0 }
 0x2bc   : > { %v1233_v40 = vpop.f32.mrf.mxu1 }
 0x2bd   : > { %v1234_v8 = vadd.f32 %v1233_v40, %v1213_v59 }
 0x2e9   : > { %v1253_v13 = vpop.f32.mrf.mxu2 }
 0x2ea   : > { %v1254_v55 = vadd.f32 %v1253_v13, %v1234_v8 }
 0x2ec   : > { %v1256_v46 = vmax.f32 %v1254_v55, 0.0 }
 0x2ee   : > { %2436 = vmatmul.msk.f32.vlgmr.msrb.gmra.mxu3 %vm1266_vm3, %v1256_v46  ;;  %2438 = vmatmul.msk.f32.vlgmr.msrb.gmra.mxu1 %vm1266_vm3, %v1256_v46 }
 0x2f6   : > { %2440 = vmatmul.msk.f32.vlgmr.msra.gmra.mxu1 %vm1266_vm3, %v1256_v46 }
 0x36b   : > { %v1317_v46 = vpop.f32.mrf.mxu1 }
 0x371   : > { %v1297_v56 = vpop.f32.mrf.mxu3 }
 0x372   : > { %v2441_v48 = vmul.f32 -1.442695, %v1297_v56  ;;  %v2442_v56 = vmul.f32 -1.442695, %v1317_v46 }
 0x374   : > { %2581 = vpow2.f32 %v2441_v48 }
 0x37a   : > { %v2582_v44 = vpop.eup %2581 }
 0x37b   : > { %v1349_v54 = vadd.f32 1.0, %v2582_v44 }
 0x37d   : > { %2583 = vrcp.f32 %v1349_v54  ;;  %v1363_v19 = vand.u32 2147483648, %v1349_v54  ;;  %v1361_v59 = vand.u32 2147483647, %v1349_v54  ;;  %vm1357_vm5 = vweird.f32 %v1349_v54 }
 0x37e   : > { %2585 = vpow2.f32 %v2442_v56 }
 0x37f   : > { %v1364_v8 = vor.u32 1.1754944e-38, %v1363_v19  ;;  %vm1362_vm7 = vcmp.eq.f32.partialorder %v1361_v59, 8.507059e+37 }
 0x383   : > { %v2584_v39 = vpop.eup %2583 }
 0x384   : > { %v1353_v58 = vmul.f32 %v2584_v39, %v1349_v54  ;;  %vm1358_vm4 = vweird.f32 %v2584_v39  ;;  %v2586_v48 = vpop.eup %2585 }
 0x385   : > { %vm1359_vm6 = vmor %vm1357_vm5, %vm1358_vm4  ;;  %v1350_v44 = vadd.f32 1.0, %v2586_v48 }
 0x386   : > { %v1354_v0 = vsub.f32 1.0, %v1353_v58 }
 0x387   : > { %2587 = vrcp.f32 %v1350_v44  ;;  %vm1372_vm9 = vweird.f32 %v1350_v44  ;;  %v1376_v54 = vand.u32 2147483647, %v1350_v44 }
 0x388   : > { %v1355_v60 = vmul.f32 %v2584_v39, %v1354_v0 }
 0x389   : > { %vm1377_vm11 = vcmp.eq.f32.partialorder %v1376_v54, 8.507059e+37 }
 0x38a   : > { %v1356_v40 = vadd.f32 %v2584_v39, %v1355_v60  ;;  %v1378_v60 = vand.u32 2147483648, %v1350_v44 }
 0x38c   : > { %v1360_v13 = vsel %vm1359_vm6, %v2584_v39, %v1356_v40  ;;  %v1379_v19 = vor.u32 1.1754944e-38, %v1378_v60  ;;  %v2659_v40 = vmov 0  }
 0x38d   : > { %v1365_v55 = vsel %vm1362_vm7, %v1364_v8, %v1360_v13  ;;  %v2588_v45 = vpop.eup %2587  ;;  %2576 = vset.pattern.permute.xlu1 %v2659_v40  ;;  %2577 = vset.pattern.permute.xlu2 %v2659_v40 }
 0x38e   : > { %1437 = vxpose.xlu0.b32.start.end [1/1] (short) %v1365_v55, 128  ;;  %v1368_v58 = vmul.f32 %v2588_v45, %v1350_v44  ;;  %vm1373_vm8 = vweird.f32 %v2588_v45 }
 0x38f   : > { %vm1374_vm10 = vmor %vm1372_vm9, %vm1373_vm8 }
 0x390   : > { %v1369_v5 = vsub.f32 1.0, %v1368_v58 }
 0x392   : > { %v1370_v0 = vmul.f32 %v2588_v45, %v1369_v5 }
 0x394   : > { %v1371_v16 = vadd.f32 %v2588_v45, %v1370_v0 }
 0x396   : > { %v1375_v39 = vsel %vm1374_vm10, %v2588_v45, %v1371_v16 }
 0x397   : > { %v1380_v59 = vsel %vm1377_vm11, %v1379_v19, %v1375_v39 }
 0x40e   : > { %1469 = vxpose.xlu0.b32.start.end [1/1] (short) %v1380_v59, 128 }
 0x432   : > { %v1453_v8 = vpop.trf.xlu0 }
 0x43a   : > { %v1454_v13 = vpop.trf.xlu0 }
 0x442   : > { %v1455_v55 = vpop.trf.xlu0 }
 0x44a   : > { %v1456_v46 = vpop.trf.xlu0 }
 0x44b   : > { %1518 = vperm.xlu1 %2576, %v1456_v46  }
 0x452   : > { %v1457_v5 = vpop.trf.xlu0 }
 0x453   : > { %1523 = vperm.xlu1 %2576, %v1457_v5  }
 0x45a   : > { %v1458_v56 = vpop.trf.xlu0 }
 0x45b   : > { %1528 = vperm.xlu1 %2576, %v1458_v56  }
 0x462   : > { %v1459_v48 = vpop.trf.xlu0 }
 0x463   : > { %1533 = vperm.xlu1 %2576, %v1459_v48  }
 0x46a   : > { %v1460_v44 = vpop.trf.xlu0 }
 0x46b   : > { %1538 = vperm.xlu1 %2576, %v1460_v44  }
 0x472   : > { %v1461_v16 = vpop.trf.xlu0 }
 0x473   : > { %1543 = vperm.xlu1 %2576, %v1461_v16  }
 0x475   : > { %2578 = vset.pattern.permute.xlu0 %v2659_v40 }
 0x47a   : > { %v1462_v45 = vpop.trf.xlu0 }
 0x47b   : > { %1548 = vperm.xlu1 %2576, %v1462_v45   ;;  %v1337_v45 = vpop.f32.mrf.mxu1 }
 0x482   : > { %v1463_v58 = vpop.trf.xlu0 }
 0x483   : > { %1553 = vperm.xlu1 %2576, %v1463_v58   ;;  %v2443_v58 = vmul.f32 -1.442695, %v1337_v45 }
 0x485   : > { %2589 = vpow2.f32 %v2443_v58 }
 0x48a   : > { %v1464_v0 = vpop.trf.xlu0 }
 0x48b   : > { %1558 = vperm.xlu1 %2576, %v1464_v0  }
 0x492   : > { %v1465_v60 = vpop.trf.xlu0 }
 0x49a   : > { %v3934_v54 = vpop.trf.xlu0 }
 0x4a2   : > { %v1467_v39 = vpop.trf.xlu0 }
 0x4a3   : > { %1573 = vperm.xlu1 %2576, %v1467_v39  }
 0x4aa   : > { %v1468_v19 = vpop.trf.xlu0 }
 0x4ab   : > { %1578 = vperm.xlu1 %2576, %v1468_v19  }
 0x4b2   : > { %v3936_v59 = vpop.trf.xlu0 }
 0x4b3   : > { %1513 = vperm.xlu1 %2576, %v1455_v55   ;;  %v2590_v55 = vpop.eup %2589 }
 0x4b4   : > { %v1351_v2 = vadd.f32 1.0, %v2590_v55 }
 0x4b6   : > { %2591 = vrcp.f32 %v1351_v2  ;;  %v1393_v63 = vand.u32 2147483648, %v1351_v2  ;;  %vm1387_vm13 = vweird.f32 %v1351_v2  ;;  %v1391_v55 = vand.u32 2147483647, %v1351_v2 }
 0x4b8   : > { %v1394_v36 = vor.u32 1.1754944e-38, %v1393_v63  ;;  %vm1392_vm15 = vcmp.eq.f32.partialorder %v1391_v55, 8.507059e+37 }
 0x4ba   : > { %v1486_v46 = vpop.trf.xlu0 }
 0x4bb   : > { %1508 = vperm.xlu1 %2576, %v1454_v13  }
 0x4bd   : > { %v3938_v5 = vpop.permute.xlu1 %1518 }
 0x4c2   : > { %v3940_v40 = vpop.trf.xlu0 }
 0x4c3   : > { %1503 = vperm.xlu1 %2576, %v1453_v8  }
 0x4c5   : > { %v3942_v56 = vpop.permute.xlu1 %1523 }
 0x4ca   : > { %v1488_v48 = vpop.trf.xlu0 }
 0x4cb   : > { %1598 = vperm.xlu1 %2576, %v1488_v48   ;;  %v2592_v48 = vpop.eup %2591 }
 0x4cc   : > { %vm1388_vm12 = vweird.f32 %v2592_v48 }
 0x4cd   : > { %v3944_v44 = vpop.permute.xlu1 %1528  ;;  %vm1389_vm14 = vmor %vm1387_vm13, %vm1388_vm12 }
 0x4d2   : > { %v1489_v16 = vpop.trf.xlu0 }
 0x4d3   : > { %1588 = vperm.xlu1 %2576, %v1486_v46   ;;  %v1383_v46 = vmul.f32 %v2592_v48, %v1351_v2  ;;  %v1411_v2 = vld [vmem:[%s4521_s5 + $0x70] sm:$0xff] }
 0x4d5   : > { %v3946_v39 = vpop.permute.xlu1 %1533  ;;  %v1384_v35 = vsub.f32 1.0, %v1383_v46 }
 0x4d7   : > { %v1385_v58 = vmul.f32 %v2592_v48, %v1384_v35 }
 0x4d9   : > { %v1386_v7 = vadd.f32 %v2592_v48, %v1385_v58 }
 0x4da   : > { %v1490_v0 = vpop.trf.xlu0 }
 0x4dd   : > { %v3948_v19 = vpop.permute.xlu1 %1538 }
 0x4e2   : > { %v1491_v13 = vpop.trf.xlu0 }
 0x4e5   : > { %v3950_v11 = vpop.permute.xlu1 %1543 }
 0x4ea   : > { %v1492_v8 = vpop.trf.xlu0 }
 0x4eb   : > { %1618 = vperm.xlu2 %2577, %v1492_v8   ;;  %v1390_v8 = vsel %vm1389_vm14, %v2592_v48, %v1386_v7 }
 0x4ed   : > { %v3952_v45 = vpop.permute.xlu1 %1548 }
 0x4f2   : > { %v1493_v38 = vpop.trf.xlu0 }
 0x4f3   : > { %1623 = vperm.xlu2 %2577, %v1493_v38   ;;  %v1395_v38 = vsel %vm1392_vm15, %v1394_v36, %v1390_v8 }
 0x4f5   : > { %v1554_v43 = vpop.permute.xlu1 %1553 }
 0x4fa   : > { %v1494_v61 = vpop.trf.xlu0 }
 0x4fb   : > { %1628 = vperm.xlu2 %2577, %v1494_v61   ;;  %v1412_v61 = vld [vmem:[%s4521_s5 + $0x78] sm:$0xff] }
 0x4fd   : > { %v1559_v25 = vpop.permute.xlu1 %1558 }
 0x502   : > { %v1495_v4 = vpop.trf.xlu0 }
 0x503   : > { %1633 = vperm.xlu2 %2577, %v1495_v4  }
 0x508   : > { %1693 = vxpose.xlu1.b32.start.end [1/1] (short) (narrow) %v1395_v38, 64 }
 0x50a   : > { %v1496_v46 = vpop.trf.xlu0 }
 0x50b   : > { %1638 = vperm.xlu2 %2577, %v1496_v46  }
 0x512   : > { %v1497_v51 = vpop.trf.xlu0 }
 0x513   : > { %1643 = vperm.xlu2 %2577, %v1497_v51  }
 0x515   : > { %v1574_v35 = vpop.permute.xlu1 %1573 }
 0x516   : > { %v1675_v7 = vmul.f32 %v1574_v35, %v1411_v2 }
 0x51a   : > { %v1498_v36 = vpop.trf.xlu0 }
 0x51b   : > { %1563 = vperm.xlu2 %2577, %v1465_v60  }
 0x51d   : > { %v1579_v4 = vpop.permute.xlu1 %1578 }
 0x51e   : > { %v1676_v63 = vmul.f32 %v1579_v4, %v1412_v61 }
 0x520   : > { %1794 = vmatpush.msra.mxu3 %v1676_v63  ;;  %v1407_v63 = vld [vmem:[%s4521_s5 + $0x50] sm:$0xff] }
 0x522   : > { %1795 = vmatpush.msra.mxu3 %v1675_v7  ;;  %v1499_v51 = vpop.trf.xlu0 }
 0x523   : > { %1648 = vperm.xlu2 %2577, %v1498_v36   ;;  %v1406_v36 = vld [vmem:[%s4521_s5 + $0x48] sm:$0xff] }
 0x525   : > { %v1514_v35 = vpop.permute.xlu1 %1513 }
 0x52a   : > { %v1500_v60 = vpop.trf.xlu0 }
 0x52b   : > { %1568 = vperm.xlu2 %2577, %v3934_v54  }
 0x533   : > { %1653 = vperm.xlu2 %2577, %v1499_v51   ;;  %v1671_v51 = vmul.f32 %v1554_v43, %v1407_v63  ;;  %v1403_v43 = vld [vmem:[%s4521_s5 + $0x30] sm:$0xff] }
 0x53b   : > { %1658 = vperm.xlu2 %2577, %v1500_v60   ;;  %v1405_v60 = vld [vmem:[%s4521_s5 + $0x40] sm:$0xff] }
 0x543   : > { %1613 = vperm.xlu2 %2577, %v1491_v13  }
 0x545   : > { %v3961_v48 = vpop.permute.xlu2 %1618 }
 0x54b   : > { %1608 = vperm.xlu2 %2577, %v1490_v0   ;;  %v1410_v0 = vld [vmem:[%s4521_s5 + $0x68] sm:$0xff] }
 0x54d   : > { %v3963_v58 = vpop.permute.xlu2 %1623 }
 0x553   : > { %1603 = vperm.xlu2 %2577, %v1489_v16   ;;  %v1409_v16 = vld [vmem:[%s4521_s5 + $0x60] sm:$0xff] }
 0x555   : > { %v3965_v55 = vpop.permute.xlu2 %1628 }
 0x55b   : > { %1593 = vperm.xlu2 %2577, %v3940_v40   ;;  %v1509_v40 = vpop.permute.xlu1 %1508 }
 0x55d   : > { %v3968_v8 = vpop.permute.xlu2 %1633 }
 0x563   : > { %1583 = vperm.xlu2 %2577, %v3936_v59   ;;  %v1408_v59 = vld [vmem:[%s4521_s5 + $0x58] sm:$0xff] }
 0x564   : > { %v1672_v7 = vmul.f32 %v1559_v25, %v1408_v59  ;;  %v1669_v25 = vmul.f32 %v3950_v11, %v1405_v60  ;;  %v1428_v59 = vld [vmem:[%s4521_s5 + $0xf8] sm:$0xff]  ;;  %v1401_v11 = vld [vmem:[%s4521_s5 + $0x20] sm:$0xff] }
 0x565   : > { %v3971_v54 = vpop.permute.xlu2 %1638  ;;  %v1665_v60 = vmul.f32 %v3942_v56, %v1401_v11  ;;  %v1398_v56 = vld [vmem:[%s4521_s5 + $0x8] sm:$0xff] }
 0x566   : > { %v1662_v11 = vmul.f32 %v1509_v40, %v1398_v56  ;;  %v4723_v40 = vld [vmem:[#allocation42_spill] sm:$0xff] }
 0x56d   : > { %v1644_v38 = vpop.permute.xlu2 %1643 }
 0x575   : > { %v1564_v46 = vpop.permute.xlu2 %1563 }
 0x576   : > { %v1673_v4 = vmul.f32 %v1564_v46, %v1409_v16  ;;  %v1670_v46 = vmul.f32 %v3952_v45, %v1406_v36  ;;  %v1404_v16 = vld [vmem:[%s4521_s5 + $0x38] sm:$0xff]  ;;  %v1402_v45 = vld [vmem:[%s4521_s5 + $0x28] sm:$0xff] }
 0x57d   : > { %v1649_v13 = vpop.permute.xlu2 %1648 }
 0x585   : > { %v1569_v61 = vpop.permute.xlu2 %1568 }
 0x586   : > { %v1674_v2 = vmul.f32 %v1569_v61, %v1410_v0  ;;  %v1504_v61 = vpop.permute.xlu1 %1503 }
 0x588   : > { %1796 = vmatpush.msra.mxu3 %v1674_v2  ;;  %v1668_v2 = vmul.f32 %v3948_v19, %v1404_v16  ;;  %v1427_v19 = vld [vmem:[%s4521_s5 + $0xf0] sm:$0xff] }
 0x589   : > { %v1399_v16 = vld [vmem:[%s4521_s5 + $0x10] sm:$0xff] }
 0x58a   : > { %1797 = vmatpush.msra.mxu3 %v1673_v4  ;;  %v1667_v4 = vmul.f32 %v3946_v39, %v1403_v43  ;;  %v1426_v39 = vld [vmem:[%s4521_s5 + $0xe8] sm:$0xff] }
 0x58c   : > { %1798 = vmatpush.msra.mxu3 %v1672_v7  ;;  %v1666_v7 = vmul.f32 %v3944_v44, %v1402_v45  ;;  %v1425_v44 = vld [vmem:[%s4521_s5 + $0xe0] sm:$0xff]  ;;  %v1663_v45 = vmul.f32 %v1514_v35, %v1399_v16 }
 0x58d   : > { %v1654_v0 = vpop.permute.xlu2 %1653 }
 0x58e   : > { %1799 = vmatpush.msra.mxu3 %v1671_v51  ;;  %v1400_v51 = vld [vmem:[%s4521_s5 + $0x18] sm:$0xff]  ;;  %v1599_v43 = vpop.permute.xlu1 %1598 }
 0x590   : > { %1800 = vmatpush.msra.mxu3 %v1670_v46  ;;  %v1691_v46 = vmul.f32 %v1654_v0, %v1427_v19  ;;  %v1424_v0 = vld [vmem:[%s4521_s5 + $0xd8] sm:$0xff] }
 0x591   : > { %v1688_v19 = vmul.f32 %v3971_v54, %v1424_v0  ;;  %v1420_v54 = vld [vmem:[%s4521_s5 + $0xb8] sm:$0xff] }
 0x592   : > { %1801 = vmatpush.msra.mxu3 %v1669_v25  ;;  %v1664_v25 = vmul.f32 %v3938_v5, %v1400_v51  ;;  %v1397_v5 = vld [vmem:[%s4521_s5] sm:$0xff]  ;;  %v4724_v51 = vmax.f32 %v4723_v40, 0.0 }
 0x593   : > { %v1661_v35 = vmul.f32 %v1504_v61, %v1397_v5  ;;  %v4727_v5 = vld [vmem:[#allocation44_spill] sm:$0xff] }
 0x594   : > { %1802 = vmatpush.msra.mxu3 %v1668_v2  ;;  %v1690_v2 = vmul.f32 %v1649_v13, %v1426_v39  ;;  %v1423_v13 = vld [vmem:[%s4521_s5 + $0xd0] sm:$0xff] }
 0x595   : > { %v1659_v63 = vpop.permute.xlu2 %1658  ;;  %v1419_v39 = vld [vmem:[%s4521_s5 + $0xb0] sm:$0xff] }
 0x596   : > { %v1692_v36 = vmul.f32 %v1659_v63, %v1428_v59  ;;  %1803 = vmatpush.msra.mxu3 %v1667_v4  ;;  %v1689_v59 = vmul.f32 %v1644_v38, %v1425_v44  ;;  %v1422_v38 = vld [vmem:[%s4521_s5 + $0xc8] sm:$0xff]  ;;  %v1687_v63 = vmul.f32 %v3968_v8, %v1423_v13  ;;  %v1589_v61 = vpop.permute.xlu1 %1588  ;;  %v4728_v13 = vmax.f32 %v4727_v5, 0.0 }
 0x598   : > { %1804 = vmatpush.msra.mxu3 %v1666_v7  ;;  %1907 = vmatpush.msra.mxu0 %v1692_v36  ;;  %v1421_v7 = vld [vmem:[%s4521_s5 + $0xc0] sm:$0xff]  ;;  %v1686_v36 = vmul.f32 %v3965_v55, %v1422_v38  ;;  %v1684_v55 = vmul.f32 %v3961_v48, %v1420_v54  ;;  %v1416_v48 = vld [vmem:[%s4521_s5 + $0x98] sm:$0xff] }
 0x599   : > { %v1685_v8 = vmul.f32 %v3963_v58, %v1421_v7  ;;  %v1417_v58 = vld [vmem:[%s4521_s5 + $0xa0] sm:$0xff] }
 0x59a   : > { %1805 = vmatpush.msra.mxu3 %v1665_v60  ;;  %1908 = vmatpush.msra.mxu0 %v1691_v46  ;;  %v1418_v46 = vld [vmem:[%s4521_s5 + $0xa8] sm:$0xff]  ;;  %v1413_v7 = vld [vmem:[%s4521_s5 + $0x80] sm:$0xff] }
 0x59c   : > { %1806 = vmatpush.msra.mxu3 %v1664_v25  ;;  %1909 = vmatpush.msra.mxu0 %v1690_v2  ;;  %v4725_v25 = vld [vmem:[#allocation43_spill] sm:$0xff] }
 0x59d   : > { %v1614_v4 = vpop.permute.xlu2 %1613  ;;  %v4726_v2 = vmax.f32 %v4725_v25, 0.0 }
 0x59e   : > { %1807 = vmatpush.msra.mxu3 %v1663_v45  ;;  %1910 = vmatpush.msra.mxu0 %v1689_v59  ;;  %v1683_v16 = vmul.f32 %v1614_v4, %v1419_v39  ;;  %v1680_v59 = vmul.f32 %v1599_v43, %v1416_v48  ;;  %v1415_v4 = vld [vmem:[%s4521_s5 + $0x90] sm:$0xff]  ;;  %v4729_v43 = vmax.f32 %v3365_v42, 0.0  ;;  %v4734_v42 = vmax.f32 %v3394_v33, 0.0 }
 0x59f   : > { %v4742_v33 = vmax.f32 %v3421_v62, 0.0  ;;  %v4748_v62 = vmax.f32 %v3451_v24, 0.0  ;;  %v4754_v24 = vmax.f32 %v3476_v32, 0.0  ;;  %v4760_v32 = vmax.f32 %v3505_v52, 0.0  ;;  %v1436_v52 = vld [vmem:[%s4521_s5 + $0x138] sm:$0xff] }
 0x5a0   : > { %1808 = vmatpush.msra.mxu3 %v1662_v11  ;;  %1911 = vmatpush.msra.mxu0 %v1688_v19  ;;  %v1414_v19 = vld [vmem:[%s4521_s5 + $0x88] sm:$0xff] }
 0x5a2   : > { %1809 = vmatpush.msra.mxu3 %v1661_v35  ;;  %1912 = vmatpush.msra.mxu0 %v1687_v63  ;;  %v1678_v63 = vmul.f32 %v1589_v61, %v1414_v19 }
 0x5a3   : > { %1810 = vmatmul.f32.vlgmr.msra.gmra.mxu3 %v4724_v51  ;;  %v4730_v51 = vmax.f32 %v3553_v50, 0.0  ;;  %v4738_v50 = vmax.f32 %v3569_v14, 0.0  ;;  %v4745_v14 = vmax.f32 %v3622_v9, 0.0  ;;  %v4751_v9 = vmax.f32 %v3687_v10, 0.0 }
 0x5a4   : > { %1913 = vmatpush.msra.mxu0 %v1686_v36  ;;  %v4757_v10 = vmax.f32 %v3727_v28, 0.0 }
 0x5a5   : > { %v1609_v60 = vpop.permute.xlu2 %1608 }
 0x5a6   : > { %1914 = vmatpush.msra.mxu0 %v1685_v8  ;;  %v1682_v44 = vmul.f32 %v1609_v60, %v1418_v46  ;;  %v4731_v8 = vld [vmem:[#allocation45_spill] sm:$0xff]  ;;  %v4733_v60 = vmax.f32 %v3540_v3, 0.0  ;;  %v4735_v46 = vmax.f32 %v3557_v37, 0.0  ;;  %v4741_v3 = vmax.f32 %v3582_v18, 0.0 }
 0x5a7   : > { %v4732_v39 = vmax.f32 %v4731_v8, 0.0  ;;  %v4747_v18 = vmax.f32 %v3651_v34, 0.0  ;;  %v4753_v34 = vmax.f32 %v3700_v21, 0.0  ;;  %v4759_v21 = vmax.f32 %v3736_v47, 0.0 }
 0x5a8   : > { %1915 = vmatpush.msra.mxu0 %v1684_v55 }
 0x5aa   : > { %1916 = vmatpush.msra.mxu0 %v1683_v16  ;;  %v4736_v16 = vld [vmem:[#allocation46_spill] sm:$0xff] }
 0x5ab   : > { %1813 = vmatmul.f32.gmra.mxu3 %v4726_v2  ;;  %v4739_v2 = vld [vmem:[#allocation47_spill] sm:$0xff] }
 0x5ac   : > { %v1709_v56 = vpop.trf.xlu1  ;;  %1917 = vmatpush.msra.mxu0 %v1682_v44  ;;  %v4737_v44 = vmax.f32 %v4736_v16, 0.0 }
 0x5ad   : > { %v1604_v0 = vpop.permute.xlu2 %1603 }
 0x5ae   : > { %v1681_v45 = vmul.f32 %v1604_v0, %v1417_v58  ;;  %v4740_v58 = vmax.f32 %v4739_v2, 0.0  ;;  %v4743_v0 = vmax.f32 %v3600_v53, 0.0  ;;  %v4749_v53 = vmax.f32 %v3672_v57, 0.0  ;;  %v4775_v2 = vld [vmem:[#allocation49_spill] sm:$0xff] }
 0x5af   : > { %v4755_v57 = vmax.f32 %v3715_v6, 0.0  ;;  %v4761_v6 = vmax.f32 %v3748_v23, 0.0 }
 0x5b0   : > { %1918 = vmatpush.msra.mxu0 %v1681_v45  ;;  %v4744_v45 = vmax.f32 %v3430_v49, 0.0  ;;  %v4750_v49 = vmax.f32 %v3460_v22, 0.0  ;;  %v4756_v22 = vmax.f32 %v3484_v15, 0.0  ;;  %v4762_v15 = vmax.f32 %v3512_v29, 0.0 }
 0x5b1   : > { %v4765_v29 = vmax.f32 %v3774_v12, 0.0  ;;  %v1435_v12 = vld [vmem:[%s4521_s5 + $0x130] sm:$0xff] }
 0x5b2   : > { %1919 = vmatpush.msra.mxu0 %v1680_v59  ;;  %v4746_v59 = vmax.f32 %v3439_v1, 0.0  ;;  %v4752_v1 = vmax.f32 %v3470_v41, 0.0  ;;  %v4758_v41 = vmax.f32 %v3494_v31, 0.0  ;;  %v4763_v31 = vmax.f32 %v3780_v20, 0.0 }
 0x5b3   : > { %1816 = vmatmul.f32.gmra.mxu3 %v4728_v13  ;;  %v4764_v13 = vmax.f32 %v3525_v17, 0.0  ;;  %v4766_v20 = vmax.f32 %v3534_v27, 0.0  ;;  %v1434_v27 = vld [vmem:[%s4521_s5 + $0x128] sm:$0xff] }
 0x5b4   : > { %v1710_v11 = vpop.trf.xlu1 }
 0x5b5   : > { %v1594_v38 = vpop.permute.xlu2 %1593 }
 0x5b6   : > { %v1679_v35 = vmul.f32 %v1594_v38, %v1415_v4 }
 0x5b8   : > { %1920 = vmatpush.msra.mxu0 %v1679_v35  ;;  %v4767_v35 = vmax.f32 %v3787_v30, 0.0  ;;  %v4769_v30 = vld [vmem:[#allocation8_spill] sm:$0xff] }
 0x5ba   : > { %1921 = vmatpush.msra.mxu0 %v1678_v63  ;;  %v4768_v63 = vmax.f32 %v3549_v26, 0.0  ;;  %v1433_v26 = vld [vmem:[%s4521_s5 + $0x120] sm:$0xff] }
 0x5bb   : > { %1819 = vmatmul.f32.gmra.mxu3 %v4729_v43 }
 0x5bc   : > { %v1711_v36 = vpop.trf.xlu1 }
 0x5bd   : > { %v1584_v54 = vpop.permute.xlu2 %1583 }
 0x5be   : > { %v1677_v40 = vmul.f32 %v1584_v54, %v1413_v7 }
 0x5c0   : > { %1922 = vmatpush.msra.mxu0 %v1677_v40 }
 0x5c1   : > { %1923 = vmatmul.f32.vlgmr.msra.gmra.mxu0 %v4730_v51  ;;  %v4770_v51 = vmax.f32 %v4769_v30, 0.0 }
 0x5c3   : > { %1822 = vmatmul.f32.gmra.mxu3 %v4732_v39  ;;  %v4771_v39 = vld [vmem:[#allocation48_spill] sm:$0xff] }
 0x5c4   : > { %v1712_v61 = vpop.trf.xlu1 }
 0x5c9   : > { %1926 = vmatmul.f32.gmra.mxu0 %v4733_v60 }
 0x5cb   : > { %1825 = vmatmul.f32.gmra.mxu3 %v4734_v42  ;;  %v1432_v42 = vld [vmem:[%s4521_s5 + $0x118] sm:$0xff] }
 0x5cc   : > { %v1713_v55 = vpop.trf.xlu1 }
 0x5d1   : > { %1929 = vmatmul.f32.gmra.mxu0 %v4735_v46 }
 0x5d3   : > { %1828 = vmatmul.f32.gmra.mxu3 %v4737_v44 }
 0x5d4   : > { %v1714_v25 = vpop.trf.xlu1 }
 0x5d9   : > { %1932 = vmatmul.f32.gmra.mxu0 %v4738_v50 }
 0x5db   : > { %1831 = vmatmul.f32.gmra.mxu3 %v4740_v58  ;;  %v4776_v58 = vmax.f32 %v4775_v2, 0.0 }
 0x5dc   : > { %v1715_v48 = vpop.trf.xlu1 }
 0x5dd   : > { %1757 = vperm.xlu0 %2578, %v1715_v48   ;;  %v1431_v48 = vld [vmem:[%s4521_s5 + $0x110] sm:$0xff] }
 0x5e1   : > { %1935 = vmatmul.f32.gmra.mxu0 %v4741_v3 }
 0x5e3   : > { %1834 = vmatmul.f32.gmra.mxu3 %v4742_v33 }
 0x5e4   : > { %v1716_v37 = vpop.trf.xlu1 }
 0x5e5   : > { %1762 = vperm.xlu2 %2577, %v1716_v37  }
 0x5e9   : > { %1938 = vmatmul.f32.gmra.mxu0 %v4743_v0 }
 0x5eb   : > { %1837 = vmatmul.f32.gmra.mxu3 %v4744_v45  ;;  %v4777_v45 = vld [vmem:[#allocation10_spill] sm:$0xff] }
 0x5ed   : > { %1752 = vperm.xlu2 %2577, %v1714_v25   ;;  %v4773_v25 = vld [vmem:[#allocation15_spill] sm:$0xff] }
 0x5ee   : > { %v4774_v50 = vmax.f32 %v4773_v25, 0.0 }
 0x5f1   : > { %1941 = vmatmul.f32.gmra.mxu0 %v4745_v14  ;;  %v4778_v14 = vmax.f32 %v4777_v45, 0.0  ;;  %v4807_v45 = vld [vmem:[#allocation13_spill] sm:$0xff] }
 0x5f3   : > { %1840 = vmatmul.f32.gmra.mxu3 %v4746_v59  ;;  %v4779_v59 = vld [vmem:[#allocation50_spill] sm:$0xff] }
 0x5f5   : > { %1747 = vperm.xlu2 %2577, %v1713_v55  }
 0x5f9   : > { %1944 = vmatmul.f32.gmra.mxu0 %v4747_v18  ;;  %v4780_v18 = vmax.f32 %v4779_v59, 0.0 }
 0x5fb   : > { %1843 = vmatmul.f32.gmra.mxu3 %v4748_v62  ;;  %v1430_v62 = vld [vmem:[%s4521_s5 + $0x108] sm:$0xff] }
 0x5fd   : > { %1742 = vperm.xlu2 %2577, %v1712_v61   ;;  %v4772_v61 = vmax.f32 %v4771_v39, 0.0 }
 0x601   : > { %1947 = vmatmul.f32.gmra.mxu0 %v4749_v53 }
 0x603   : > { %1846 = vmatmul.f32.gmra.mxu3 %v4750_v49 }
 0x605   : > { %1737 = vperm.xlu2 %2577, %v1711_v36  }
 0x609   : > { %1950 = vmatmul.f32.gmra.mxu0 %v4751_v9 }
 0x60b   : > { %1849 = vmatmul.f32.gmra.mxu3 %v4752_v1 }
 0x60d   : > { %1732 = vperm.xlu2 %2577, %v1710_v11  }
 0x611   : > { %1953 = vmatmul.f32.gmra.mxu0 %v4753_v34  ;;  %v4781_v34 = vld [vmem:[#allocation17_spill] sm:$0xff] }
 0x613   : > { %1852 = vmatmul.f32.gmra.mxu3 %v4754_v24  ;;  %v4782_v24 = vmax.f32 %v4781_v34, 0.0 }
 0x615   : > { %1727 = vperm.xlu2 %2577, %v1709_v56  }
 0x619   : > { %1956 = vmatmul.f32.gmra.mxu0 %v4755_v57  ;;  %v4783_v57 = vld [vmem:[#allocation51_spill] sm:$0xff] }
 0x61b   : > { %1855 = vmatmul.f32.gmra.mxu3 %v4756_v22  ;;  %v4784_v22 = vmax.f32 %v4783_v57, 0.0 }
 0x621   : > { %1959 = vmatmul.f32.gmra.mxu0 %v4757_v10  ;;  %v1429_v10 = vld [vmem:[%s4521_s5 + $0x100] sm:$0xff] }
 0x623   : > { %1858 = vmatmul.f32.gmra.mxu3 %v4758_v41 }
 0x626   : > { %v4135_v5 = vpop.f32.mrf.mxu3 }
 0x629   : > { %1962 = vmatmul.f32.gmra.mxu0 %v4759_v21 }
 0x62b   : > { %1861 = vmatmul.f32.gmra.mxu3 %v4760_v32 }
 0x62e   : > { %v4141_v56 = vpop.f32.mrf.mxu3 }
 0x631   : > { %1965 = vmatmul.f32.gmra.mxu0 %v4761_v6 }
 0x633   : > { %1864 = vmatmul.f32.gmra.mxu3 %v4762_v15  ;;  %v4785_v15 = vld [vmem:[#allocation12_spill] sm:$0xff] }
 0x636   : > { %v4147_v28 = vpop.f32.mrf.mxu3 }
 0x639   : > { %1968 = vmatmul.f32.gmra.mxu0 %v4763_v31  ;;  %v4786_v31 = vmax.f32 %v4785_v15, 0.0 }
 0x63b   : > { %1867 = vmatmul.f32.gmra.mxu3 %v4764_v13  ;;  %v2593_v13 = vld [vmem:[%s3634_s10] sm:$0x1]  ;;  %s253_s10 = sand.u32 1, %s2648_s22  }
 0x63c   : > { %s2175_s14 = sshll.u32 %s253_s10, 8  ;;  %s2085_s25 = scalar_lea.sflag [#allocation3], %s253_s10 }
 0x63d   : > { %s4366_s15 = scalar_lea.vmem [#allocation2], %s2175_s14 }
 0x63e   : > { %v4156_v47 = vpop.f32.mrf.mxu3  ;;  %v4158_v4 = vpop.f32.mrf.mxu0  ;;  %s2097_s26 = sshll.u32 %s4366_s15, 4  ;;  %s2098_s26 = int_to_ptr.vmem [resolvable:$true] %s2097_s26 }
 0x63f   : > { %v1763_v23 = vpop.permute.xlu2 %1762 }
 0x640   : > { %v1772_v11 = vmul.f32 %v1763_v23, %v1436_v52  ;;  %v4787_v52 = vld [vmem:[#allocation5_spill] sm:$0xff] }
 0x641   : > { %1971 = vmatmul.f32.gmra.mxu0 %v4765_v29  ;;  %v4788_v23 = vmax.f32 %v4787_v52, 0.0 }
 0x642   : > { %1781 = vmatpush.msrb.mxu2 %v1772_v11 }
 0x643   : > { %1870 = vmatmul.f32.gmra.mxu3 %v4766_v20  ;;  %v4789_v20 = vld [vmem:[#allocation14_spill] sm:$0xff] }
 0x646   : > { %v4164_v19 = vpop.f32.mrf.mxu3  ;;  %v4166_v17 = vpop.f32.mrf.mxu0 }
 0x647   : > { %v1753_v38 = vpop.permute.xlu2 %1752 }
 0x648   : > { %v1770_v8 = vmul.f32 %v1753_v38, %v1434_v27  ;;  %v4790_v38 = vmax.f32 %v4789_v20, 0.0 }
 0x649   : > { %1974 = vmatmul.f32.gmra.mxu0 %v4767_v35  ;;  %v4791_v35 = vld [vmem:[#allocation9_spill] sm:$0xff] }
 0x64b   : > { %1873 = vmatmul.f32.gmra.mxu3 %v4768_v63  ;;  %v4792_v63 = vmax.f32 %v4791_v35, 0.0 }
 0x64e   : > { %v4175_v43 = vpop.f32.mrf.mxu3  ;;  %v4177_v7 = vpop.f32.mrf.mxu0 }
 0x64f   : > { %v1758_v36 = vpop.permute.xlu0 %1757  ;;  %v1748_v54 = vpop.permute.xlu2 %1747 }
 0x650   : > { %v1771_v40 = vmul.f32 %v1758_v36, %v1435_v12  ;;  %v1769_v60 = vmul.f32 %v1748_v54, %v1433_v26  ;;  %v4793_v36 = vld [vmem:[#allocation16_spill] sm:$0xff] }
 0x651   : > { %1977 = vmatmul.f32.gmra.mxu0 %v4770_v51  ;;  %v4794_v54 = vmax.f32 %v4793_v36, 0.0 }
 0x652   : > { %1782 = vmatpush.msrb.mxu2 %v1771_v40  ;;  %v4795_v40 = vld [vmem:[#allocation6_spill] sm:$0xff] }
 0x653   : > { %1876 = vmatmul.f32.gmra.mxu3 %v4772_v61  ;;  %v4796_v26 = vmax.f32 %v4795_v40, 0.0  ;;  %v4799_v61 = vld [vmem:[#allocation11_spill] sm:$0xff] }
 0x654   : > { %1783 = vmatpush.msrb.mxu2 %v1770_v8  ;;  %v4797_v8 = vld [vmem:[#allocation19_spill] sm:$0xff] }
 0x655   : > { %v4798_v39 = vmax.f32 %v4797_v8, 0.0 }
 0x656   : > { %1784 = vmatpush.msrb.mxu2 %v1769_v60  ;;  %v4192_v55 = vpop.f32.mrf.mxu3  ;;  %v4194_v46 = vpop.f32.mrf.mxu0  ;;  %v4800_v60 = vmax.f32 %v4799_v61, 0.0 }
 0x657   : > { %v1743_v16 = vpop.permute.xlu2 %1742 }
 0x658   : > { %v1768_v44 = vmul.f32 %v1743_v16, %v1432_v42 }
 0x659   : > { %1980 = vmatmul.f32.gmra.mxu0 %v4774_v50  ;;  %v4803_v50 = vld [vmem:[#allocation7_spill] sm:$0xff] }
 0x65a   : > { %1785 = vmatpush.msrb.mxu2 %v1768_v44  ;;  %v4801_v44 = vld [vmem:[#allocation18_spill] sm:$0xff]  ;;  %v4804_v2 = vmax.f32 %v4803_v50, 0.0 }
 0x65b   : > { %1879 = vmatmul.f32.gmra.mxu3 %v4776_v58  ;;  %v4802_v25 = vmax.f32 %v4801_v44, 0.0 }
 0x65e   : > { %v4203_v3 = vpop.f32.mrf.mxu3  ;;  %v4205_v33 = vpop.f32.mrf.mxu0 }
 0x65f   : > { %v1738_v37 = vpop.permute.xlu2 %1737 }
 0x660   : > { %v1767_v0 = vmul.f32 %v1738_v37, %v1431_v48  ;;  %v4805_v37 = vld [vmem:[#allocation21_spill] sm:$0xff] }
 0x661   : > { %1983 = vmatmul.f32.gmra.mxu0 %v4778_v14  ;;  %v4808_v14 = vmax.f32 %v4807_v45, 0.0 }
 0x662   : > { %1786 = vmatpush.msrb.mxu2 %v1767_v0  ;;  %v4806_v0 = vmax.f32 %v4805_v37, 0.0 }
 0x663   : > { %1882 = vmatmul.f32.gmra.mxu3 %v4780_v18 }
 0x666   : > { %v4214_v53 = vpop.f32.mrf.mxu3  ;;  %v4216_v49 = vpop.f32.mrf.mxu0 }
 0x667   : > { %v1733_v9 = vpop.permute.xlu2 %1732 }
 0x668   : > { %v1766_v1 = vmul.f32 %v1733_v9, %v1430_v62  ;;  %v4809_v62 = vld [vmem:[#allocation37_spill] sm:$0xff] }
 0x669   : > { %1986 = vmatmul.f32.gmra.mxu0 %v4782_v24  ;;  %v4810_v9 = vmax.f32 %v4809_v62, 0.0  ;;  %v4811_v24 = vld [vmem:[#allocation20_spill] sm:$0xff] }
 0x66a   : > { %1787 = vmatpush.msrb.mxu2 %v1766_v1  ;;  %v4812_v57 = vmax.f32 %v4811_v24, 0.0 }
 0x66b   : > { %1885 = vmatmul.f32.gmra.mxu3 %v4784_v22 }
 0x66e   : > { %v4225_v41 = vpop.f32.mrf.mxu3  ;;  %v4227_v21 = vpop.f32.mrf.mxu0 }
 0x66f   : > { %v1728_v32 = vpop.permute.xlu2 %1727 }
 0x670   : > { %v1765_v6 = vmul.f32 %v1728_v32, %v1429_v10  ;;  %v4813_v32 = vld [vmem:[#allocation22_spill] sm:$0xff] }
 0x671   : > { %1989 = vmatmul.f32.gmra.mxu0 %v4786_v31 }
 0x672   : > { %1788 = vmatpush.msrb.mxu2 %v1765_v6  ;;  %v4814_v6 = vmax.f32 %v4813_v32, 0.0 }
 0x673   : > { %2444 = vmatmul.msk.f32.vlgmr.msrb.gmra.mxu2 %vm1192_vm0, %v2593_v13  ;;  %1888 = vmatmul.f32.gmra.mxu3 %v4788_v23  ;;  %v4815_v13 = vld [vmem:[#allocation38_spill] sm:$0xff] }
 0x674   : > { %v4816_v52 = vmax.f32 %v4815_v13, 0.0 }
 0x676   : > { %v4235_v11 = vpop.f32.mrf.mxu3  ;;  %v4237_v29 = vpop.f32.mrf.mxu0 }
 0x679   : > { %1992 = vmatmul.f32.gmra.mxu0 %v4790_v38 }
 0x67b   : > { %1891 = vmatmul.f32.gmra.mxu3 %v4792_v63 }
 0x67e   : > { %v4243_v12 = vpop.f32.mrf.mxu3  ;;  %v4245_v27 = vpop.f32.mrf.mxu0 }
 0x681   : > { %1995 = vmatmul.f32.gmra.mxu0 %v4794_v54 }
 0x683   : > { %1894 = vmatmul.f32.gmra.mxu3 %v4796_v26 }
 0x686   : > { %v4251_v30 = vpop.f32.mrf.mxu3  ;;  %v4253_v51 = vpop.f32.mrf.mxu0 }
 0x689   : > { %1998 = vmatmul.f32.gmra.mxu0 %v4798_v39 }
 0x68b   : > { %1897 = vmatmul.f32.gmra.mxu3 %v4800_v60 }
 0x68e   : > { %v4259_v42 = vpop.f32.mrf.mxu3  ;;  %v4261_v16 = vpop.f32.mrf.mxu0 }
 0x691   : > { %2001 = vmatmul.f32.gmra.mxu0 %v4802_v25 }
 0x693   : > { %1900 = vmatmul.f32.gmra.mxu3 %v4804_v2 }
 0x696   : > { %v4267_v58 = vpop.f32.mrf.mxu3  ;;  %v4269_v48 = vpop.f32.mrf.mxu0 }
 0x699   : > { %2004 = vmatmul.f32.gmra.mxu0 %v4806_v0 }
 0x69b   : > { %1903 = vmatmul.f32.gmra.mxu3 %v4808_v14 }
 0x69e   : > { %v4275_v59 = vpop.f32.mrf.mxu3  ;;  %v4277_v18 = vpop.f32.mrf.mxu0 }
 0x6a1   : > { %2007 = vmatmul.f32.gmra.mxu0 %v4810_v9 }
 0x6a6   : > { %v4281_v1 = vpop.f32.mrf.mxu3  ;;  %v4283_v34 = vpop.f32.mrf.mxu0 }
 0x6a9   : > { %2010 = vmatmul.f32.gmra.mxu0 %v4812_v57 }
 0x6ae   : > { %v4287_v22 = vpop.f32.mrf.mxu3  ;;  %v4289_v10 = vpop.f32.mrf.mxu0 }
 0x6b1   : > { %2013 = vmatmul.f32.gmra.mxu0 %v4814_v6 }
 0x6b6   : > { %v1865_v15 = vpop.f32.mrf.mxu3  ;;  %v4293_v31 = vpop.f32.mrf.mxu0 }
 0x6b9   : > { %2016 = vmatmul.f32.gmra.mxu0 %v4816_v52 }
 0x6be   : > { %v4297_v23 = vpop.f32.mrf.mxu3  ;;  %v4299_v20 = vpop.f32.mrf.mxu0 }
 0x6c6   : > { %v4301_v38 = vpop.f32.mrf.mxu3  ;;  %v4303_v35 = vpop.f32.mrf.mxu0 }
 0x6ce   : > { %v1978_v63 = vpop.f32.mrf.mxu0  ;;  %v4305_v36 = vpop.f32.mrf.mxu3 }
 0x6d6   : > { %v4307_v54 = vpop.f32.mrf.mxu0  ;;  %v4309_v40 = vpop.f32.mrf.mxu3 }
 0x6de   : > { %v4311_v26 = vpop.f32.mrf.mxu0  ;;  %v1880_v8 = vpop.f32.mrf.mxu3 }
 0x6e6   : > { %v4313_v39 = vpop.f32.mrf.mxu0  ;;  %v4315_v61 = vpop.f32.mrf.mxu3 }
 0x6ee   : > { %v4317_v60 = vpop.f32.mrf.mxu0  ;;  %v4319_v25 = vpop.f32.mrf.mxu3 }
 0x6f6   : > { %v1790_v44 = vpop.f32.mrf.mxu2  ;;  %v1993_v50 = vpop.f32.mrf.mxu0 }
 0x6f7   : > { %v4321_v2 = vperm.slane %v1790_v44, 0  ;;  %v4342_v57 = vpop.f32.mrf.mxu3 }
 0x6f9   : > { %v1812_v37 = vadd.f32 %v4135_v5, %v4321_v2  ;;  %v1815_v0 = vadd.f32 %v4141_v56, %v4321_v2  ;;  %v1818_v45 = vadd.f32 %v4147_v28, %v4321_v2  ;;  %v1821_v14 = vadd.f32 %v4156_v47, %v4321_v2 }
 0x6fa   : > { %v1824_v9 = vadd.f32 %v4164_v19, %v4321_v2  ;;  %v1866_v24 = vadd.f32 %v1865_v15, %v4321_v2  ;;  %v1827_v5 = vadd.f32 %v4175_v43, %v4321_v2  ;;  %v1881_v56 = vadd.f32 %v1880_v8, %v4321_v2 }
 0x6fb   : > { %v1925_v28 = vadd.f32 %v4158_v4, %v1812_v37  ;;  %v1830_v47 = vadd.f32 %v4192_v55, %v4321_v2  ;;  %v1928_v32 = vadd.f32 %v4166_v17, %v1815_v0  ;;  %v1931_v19 = vadd.f32 %v4177_v7, %v1818_v45 }
 0x6fc   : > { %v1833_v6 = vadd.f32 %v4203_v3, %v4321_v2  ;;  %v1934_v15 = vadd.f32 %v4194_v46, %v1821_v14  ;;  %v1836_v43 = vadd.f32 %v4214_v53, %v4321_v2  ;;  %v1937_v13 = vadd.f32 %v4205_v33, %v1824_v9 }
 0x6fd   : > { %v4355_v52 = vadd.f32 %v1978_v63, %v1866_v24  ;;  %v1839_v4 = vadd.f32 %v4225_v41, %v4321_v2  ;;  %v1940_v55 = vadd.f32 %v4216_v49, %v1827_v5  ;;  %v1994_v17 = vadd.f32 %v1993_v50, %v1881_v56 }
 0x6fe   : > { %v4332_v62 = vpop.f32.mrf.mxu0  ;;  %v2020_v8 = vmax.f32 %v1925_v28, 0.0  ;;  %v1842_v7 = vadd.f32 %v4235_v11, %v4321_v2  ;;  %v1943_v3 = vadd.f32 %v4227_v21, %v1830_v47  ;;  %v2021_v46 = vmax.f32 %v1928_v32, 0.0 }
 0x6ff   : > { %v2022_v44 = vmax.f32 %v1931_v19, 0.0  ;;  %v1845_v53 = vadd.f32 %v4243_v12, %v4321_v2  ;;  %v1946_v33 = vadd.f32 %v4237_v29, %v1833_v6  ;;  %v2043_v63 = vmax.f32 %v1994_v17, 0.0 }
 0x700   : > { %v2023_v37 = vmax.f32 %v1934_v15, 0.0  ;;  %2052 = vst.msk [vmem:[%s4366_s15] sm:$0xff] %vm1192_vm0, %v2020_v8  ;;  %v1848_v41 = vadd.f32 %v4251_v30, %v4321_v2  ;;  %v1949_v21 = vadd.f32 %v4245_v27, %v1836_v43  ;;  %v2024_v11 = vmax.f32 %v1937_v13, 0.0 }
 0x701   : > { %2053 = vst.msk [vmem:[%s4366_s15 + $0x8] sm:$0xff] %vm1192_vm0, %v2021_v46  ;;  %v1851_v29 = vadd.f32 %v4259_v42, %v4321_v2  ;;  %v1952_v12 = vadd.f32 %v4253_v51, %v1839_v4  ;;  %v2025_v50 = vmax.f32 %v1940_v55, 0.0  ;;  %v1854_v0 = vadd.f32 %v4267_v58, %v4321_v2  ;;  %v1892_v51 = vpop.f32.mrf.mxu3 }
 0x702   : > { %2075 = vst.msk [vmem:[%s4366_s15 + $0xb8] sm:$0xff] %vm1192_vm0, %v2043_v63  ;;  %v1955_v30 = vadd.f32 %v4261_v16, %v1842_v7  ;;  %v2026_v45 = vmax.f32 %v1943_v3, 0.0  ;;  %v1857_v27 = vadd.f32 %v4275_v59, %v4321_v2  ;;  %v1958_v42 = vadd.f32 %v4269_v48, %v1845_v53 }
 0x703   : > { %2054 = vst.msk [vmem:[%s4366_s15 + $0x10] sm:$0xff] %vm1192_vm0, %v2022_v44  ;;  %v2027_v14 = vmax.f32 %v1946_v33, 0.0  ;;  %v1860_v58 = vadd.f32 %v4281_v1, %v4321_v2  ;;  %v1961_v9 = vadd.f32 %v4277_v18, %v1848_v41  ;;  %v2028_v16 = vmax.f32 %v1949_v21, 0.0 }
 0x704   : > { %2055 = vst.msk [vmem:[%s4366_s15 + $0x18] sm:$0xff] %vm1192_vm0, %v2023_v37  ;;  %v1863_v24 = vadd.f32 %v4287_v22, %v4321_v2  ;;  %v1964_v59 = vadd.f32 %v4283_v34, %v1851_v29  ;;  %v2029_v48 = vmax.f32 %v1952_v12, 0.0  ;;  %v1967_v5 = vadd.f32 %v4289_v10, %v1854_v0 }
 0x705   : > { %2056 = vst.msk [vmem:[%s4366_s15 + $0x20] sm:$0xff] %vm1192_vm0, %v2024_v11  ;;  %v2030_v56 = vmax.f32 %v1955_v30, 0.0  ;;  %v1869_v18 = vadd.f32 %v4297_v23, %v4321_v2  ;;  %v1970_v1 = vadd.f32 %v4293_v31, %v1857_v27  ;;  %v2031_v28 = vmax.f32 %v1958_v42, 0.0 }
 0x706   : > { %v4370_v49 = vpop.f32.mrf.mxu0  ;;  %2057 = vst.msk [vmem:[%s4366_s15 + $0x28] sm:$0xff] %vm1192_vm0, %v2025_v50  ;;  %v1872_v22 = vadd.f32 %v4301_v38, %v4321_v2  ;;  %v1973_v10 = vadd.f32 %v4299_v20, %v1860_v58  ;;  %v2032_v47 = vmax.f32 %v1961_v9, 0.0  ;;  %v1875_v32 = vadd.f32 %v4305_v36, %v4321_v2 }
 0x707   : > { %2058 = vst.msk [vmem:[%s4366_s15 + $0x30] sm:$0xff] %vm1192_vm0, %v2026_v45  ;;  %v1976_v31 = vadd.f32 %v4303_v35, %v1863_v24  ;;  %v2033_v23 = vmax.f32 %v1964_v59, 0.0  ;;  %v1878_v19 = vadd.f32 %v4309_v40, %v4321_v2  ;;  %v2034_v6 = vmax.f32 %v1967_v5, 0.0 }
 0x708   : > { %2059 = vst.msk [vmem:[%s4366_s15 + $0x38] sm:$0xff] %vm1192_vm0, %v2027_v14  ;;  %v1982_v20 = vadd.f32 %v4307_v54, %v1869_v18  ;;  %v2035_v38 = vmax.f32 %v1970_v1, 0.0  ;;  %v1985_v36 = vadd.f32 %v4311_v26, %v1872_v22  ;;  %v2036_v15 = vmax.f32 %v1973_v10, 0.0 }
 0x709   : > { %2060 = vst.msk [vmem:[%s4366_s15 + $0x40] sm:$0xff] %vm1192_vm0, %v2028_v16  ;;  %v1884_v35 = vadd.f32 %v4315_v61, %v4321_v2  ;;  %v1988_v40 = vadd.f32 %v4313_v39, %v1875_v32  ;;  %v2037_v43 = vmax.f32 %v1976_v31, 0.0  ;;  %v1895_v54 = vpop.f32.mrf.mxu3  ;;  %v1887_v13 = vadd.f32 %v4319_v25, %v4321_v2 }
 0x70a   : > { %2061 = vst.msk [vmem:[%s4366_s15 + $0x48] sm:$0xff] %vm1192_vm0, %v2029_v48  ;;  %v1991_v4 = vadd.f32 %v4317_v60, %v1878_v19  ;;  %v2038_v26 = vmax.f32 %v4355_v52, 0.0  ;;  %v1890_v61 = vadd.f32 %v4342_v57, %v4321_v2  ;;  %v2039_v39 = vmax.f32 %v1982_v20, 0.0 }
 0x70b   : > { %2062 = vst.msk [vmem:[%s4366_s15 + $0x50] sm:$0xff] %vm1192_vm0, %v2030_v56  ;;  %v1997_v55 = vadd.f32 %v4332_v62, %v1884_v35  ;;  %v2040_v25 = vmax.f32 %v1985_v36, 0.0  ;;  %v1893_v60 = vadd.f32 %v1892_v51, %v4321_v2  ;;  %v2000_v52 = vadd.f32 %v4370_v49, %v1887_v13 }
 0x70c   : > { %2063 = vst.msk [vmem:[%s4366_s15 + $0x58] sm:$0xff] %vm1192_vm0, %v2031_v28  ;;  %v2041_v8 = vmax.f32 %v1988_v40, 0.0  ;;  %v2042_v7 = vmax.f32 %v1991_v4, 0.0  ;;  %v1896_v53 = vadd.f32 %v1895_v54, %v4321_v2 }
 0x70d   : > { %2064 = vst.msk [vmem:[%s4366_s15 + $0x60] sm:$0xff] %vm1192_vm0, %v2032_v47  ;;  %v2044_v3 = vmax.f32 %v1997_v55, 0.0  ;;  %v2045_v46 = vmax.f32 %v2000_v52, 0.0 }
 0x70e   : > { %v2002_v34 = vpop.f32.mrf.mxu0  ;;  %2065 = vst.msk [vmem:[%s4366_s15 + $0x68] sm:$0xff] %vm1192_vm0, %v2033_v23 }
 0x70f   : > { %2066 = vst.msk [vmem:[%s4366_s15 + $0x70] sm:$0xff] %vm1192_vm0, %v2034_v6  ;;  %v2003_v57 = vadd.f32 %v2002_v34, %v1890_v61 }
 0x710   : > { %2067 = vst.msk [vmem:[%s4366_s15 + $0x78] sm:$0xff] %vm1192_vm0, %v2035_v38 }
 0x711   : > { %2068 = vst.msk [vmem:[%s4366_s15 + $0x80] sm:$0xff] %vm1192_vm0, %v2036_v15  ;;  %v2046_v44 = vmax.f32 %v2003_v57, 0.0  ;;  %v1898_v63 = vpop.f32.mrf.mxu3 }
 0x712   : > { %2069 = vst.msk [vmem:[%s4366_s15 + $0x88] sm:$0xff] %vm1192_vm0, %v2037_v43  ;;  %v1899_v21 = vadd.f32 %v1898_v63, %v4321_v2 }
 0x713   : > { %2070 = vst.msk [vmem:[%s4366_s15 + $0x90] sm:$0xff] %vm1192_vm0, %v2038_v26 }
 0x714   : > { %2071 = vst.msk [vmem:[%s4366_s15 + $0x98] sm:$0xff] %vm1192_vm0, %v2039_v39 }
 0x715   : > { %2072 = vst.msk [vmem:[%s4366_s15 + $0xa0] sm:$0xff] %vm1192_vm0, %v2040_v25 }
 0x716   : > { %v2005_v17 = vpop.f32.mrf.mxu0  ;;  %2073 = vst.msk [vmem:[%s4366_s15 + $0xa8] sm:$0xff] %vm1192_vm0, %v2041_v8 }
 0x717   : > { %v2006_v62 = vadd.f32 %v2005_v17, %v1893_v60  ;;  %2074 = vst.msk [vmem:[%s4366_s15 + $0xb0] sm:$0xff] %vm1192_vm0, %v2042_v7 }
 0x718   : > { %2076 = vst.msk [vmem:[%s4366_s15 + $0xc0] sm:$0xff] %vm1192_vm0, %v2044_v3 }
 0x719   : > { %v2047_v33 = vmax.f32 %v2006_v62, 0.0  ;;  %2077 = vst.msk [vmem:[%s4366_s15 + $0xc8] sm:$0xff] %vm1192_vm0, %v2045_v46  ;;  %v1901_v12 = vpop.f32.mrf.mxu3 }
 0x71a   : > { %2078 = vst.msk [vmem:[%s4366_s15 + $0xd0] sm:$0xff] %vm1192_vm0, %v2046_v44  ;;  %v1902_v0 = vadd.f32 %v1901_v12, %v4321_v2 }
 0x71b   : > { %2079 = vst.msk [vmem:[%s4366_s15 + $0xd8] sm:$0xff] %vm1192_vm0, %v2047_v33 }
 0x71e   : > { %v2008_v37 = vpop.f32.mrf.mxu0 }
 0x71f   : > { %v2009_v49 = vadd.f32 %v2008_v37, %v1896_v53 }
 0x721   : > { %v2048_v41 = vmax.f32 %v2009_v49, 0.0  ;;  %v1904_v42 = vpop.f32.mrf.mxu3 }
 0x722   : > { %v1905_v14 = vadd.f32 %v1904_v42, %v4321_v2 }
 0x723   : > { %2080 = vst.msk [vmem:[%s4366_s15 + $0xe0] sm:$0xff] %vm1192_vm0, %v2048_v41 }
 0x726   : > { %v2011_v11 = vpop.f32.mrf.mxu0 }
 0x727   : > { %v2012_v29 = vadd.f32 %v2011_v11, %v1899_v21 }
 0x729   : > { %v2049_v50 = vmax.f32 %v2012_v29, 0.0 }
 0x72b   : > { %2081 = vst.msk [vmem:[%s4366_s15 + $0xe8] sm:$0xff] %vm1192_vm0, %v2049_v50 }
 0x72e   : > { %v2014_v30 = vpop.f32.mrf.mxu0 }
 0x72f   : > { %v2015_v45 = vadd.f32 %v2014_v30, %v1902_v0 }
 0x731   : > { %v2050_v27 = vmax.f32 %v2015_v45, 0.0 }
 0x733   : > { %2082 = vst.msk [vmem:[%s4366_s15 + $0xf0] sm:$0xff] %vm1192_vm0, %v2050_v27 }
 0x736   : > { %v2017_v51 = vpop.f32.mrf.mxu0 }
 0x737   : > { %v2018_v58 = vadd.f32 %v2017_v51, %v1905_v14 }
 0x739   : > { %v2051_v9 = vmax.f32 %v2018_v58, 0.0 }
 0x73b   : > { %2083 = vst.msk [vmem:[%s4366_s15 + $0xf8] sm:$0xff] %vm1192_vm0, %v2051_v9 }
 0x73c   : > { %2621 = shalt.err (!%p2618_p3)
}
 0x73d   : > { %s2660_s10 = smov 128   ;;  %s2661_s15 = smov 8  }
 0x73e   : > { %2532 = dma.vmem_to_hbm [thread:$0]  (%p2735_p5), %s2098_s26, 4096, %s2100_s28, %s2085_s25, %s2660_s10, %s2660_s10, %s2661_s15  }
 0x73f PF: > { %p2538_p4 = scmp.ge.s32.totalorder %s2656_s24, 2  ;;  %s2114_s18 = sand.u32 1, %s2644_s21  }
 0x740   : > { %s2115_s17 = scalar_lea.sflag [#allocation3], %s2114_s18 }
 0x741   : > { %p2535_p7 = pnand %p2538_p4, %p2739_p6 }
 0x743   : > { %p2536_p8 = pneg %p2535_p7 }
 0x745   : > { %2639 = dma.done.wait (%p2536_p8), %s2115_s17, 4096  }
 0x746   : > { %2641 = vsyncadd (%p2536_p8), %s2115_s17, 4294963200  ;;  %p16_p9 = scmp.ge.s32.totalorder %s2722_s27, 4   ;;  %s4817_s21 = smov %s2648_s22 }
 0x747   : > { %s4818_s22 = smov %s2652_s23  ;;  %s4819_s23 = smov %s2733_s30 }
 0x748   : > { %s4820_s24 = smov %s2722_s27  ;;  %18 = sbr.rel (!%p16_p9) target bundleno = 3 (0x3), region = 82 }
 0x74d   :  { %2121 = vsyncpa [#allocation3], 1 }
 0x74e   :  { %2123 = vsyncpa [#allocation3 + $0x1], 1 }

</bundles_post_ra>
